<compile_context>
chip_gen: v6e
topology: v6e:2x2x1
jax: 0.10.0
libtpu: 0.0.40
codegen_flags: <defaults>
</compile_context>

<pallas_src>
import math
import functools

import jax
import jax.numpy as jnp
from jax import lax
from jax.experimental import pallas as pl
from jax.experimental.pallas import tpu as pltpu


def _layer_norm(x, w, b, eps=1e-5):
    mu = jnp.mean(x, axis=-1, keepdims=True)
    var = jnp.mean((x - mu) ** 2, axis=-1, keepdims=True)
    return (x - mu) * lax.rsqrt(var + eps) * w + b


def encoder_layer_kernel(z_ref, ln1w_ref, ln1b_ref,
                         wqkv_ref, bqkv_ref, wo_ref, bo_ref,
                         ln2w_ref, ln2b_ref,
                         w1_ref, b1_ref, w2_ref, b2_ref,
                         out_ref,
                         qkv_sc, attn_sc,
                         *, seq_len, nhead, compute_dtype, approx_recip):
    BL, D = z_ref.shape                 # (B_TILE * L, D)
    L = seq_len
    B = BL // L
    hd = D // nhead
    scale = 1.0 / math.sqrt(hd)
    cdt = compute_dtype

    z = z_ref[...].astype(jnp.float32)  # (BL, D)

    # ---- LayerNorm1 (f32) ----
    z1 = _layer_norm(z, ln1w_ref[...], ln1b_ref[...])

    # ---- fused Q|K|V projection: one (BL, D) x (D, 3D) MXU pass ----
    qkv = jnp.dot(z1.astype(cdt), wqkv_ref[...],
                  preferred_element_type=jnp.float32) + bqkv_ref[...]
    qkv_sc[...] = qkv                   # (BL, 3D) f32 scratch

    wo = wo_ref[...]                    # (D, D), loaded once

    # ---- Multi-head self-attention ----
    # fori_loop over the B sequences of the block bounds live ranges; each
    # head's scores are consumed immediately by the fused out-proj slice, so
    # there is no concatenate and no transpose anywhere.
    def attn_body(b, carry):
        row = b * L
        if L % 8 == 0:
            row = pl.multiple_of(row, 8)
        qkv_b = qkv_sc[pl.ds(row, L), :]                     # (L, 3D) f32
        acc = jnp.zeros((L, D), jnp.float32)
        for h in range(nhead):                               # short static loop
            lo = h * hd
            qh = qkv_b[:, lo:lo + hd] * scale                # PyTorch q scaling
            kh = qkv_b[:, D + lo:D + lo + hd]
            vh = qkv_b[:, 2 * D + lo:2 * D + lo + hd]
            # q @ k^T via dot_general on the trailing dims (no explicit .T)
            s = lax.dot_general(qh.astype(cdt), kh.astype(cdt),
                                (((1,), (1,)), ((), ())),
                                preferred_element_type=jnp.float32)  # (L, L)
            s = s - jnp.max(s, axis=-1, keepdims=True)
            p = jnp.exp(s)
            p = p * pl.reciprocal(jnp.sum(p, axis=-1, keepdims=True),
                                  approx=approx_recip)
            o = jnp.dot(p.astype(cdt), vh.astype(cdt),
                        preferred_element_type=jnp.float32)          # (L, hd)
            # fused per-head slice of the output projection (replaces concat)
            acc = acc + jnp.dot(o.astype(cdt), wo[lo:lo + hd, :],
                                preferred_element_type=jnp.float32)  # (L, D)
        attn_sc[pl.ds(row, L), :] = acc
        return carry

    lax.fori_loop(0, B, attn_body, 0)

    # ---- residual 1 (dropout is identity at inference) ----
    z3 = attn_sc[...] + bo_ref[...] + z

    # ---- LayerNorm2 + FeedForward + residual 2 (batched over BL rows) ----
    z4 = _layer_norm(z3, ln2w_ref[...], ln2b_ref[...])
    h1 = jnp.dot(z4.astype(cdt), w1_ref[...],
                 preferred_element_type=jnp.float32) + b1_ref[...]
    h1 = jnp.maximum(h1, 0.0)
    ff = jnp.dot(h1.astype(cdt), w2_ref[...],
                 preferred_element_type=jnp.float32) + b2_ref[...]

    out_ref[...] = (ff + z3).astype(out_ref.dtype)


def transformer_encoder_layer(z_lne, params, nhead, *, b_tile=4, use_bf16=True):
    """z_lne: (L, N, E) like PyTorch nn.MultiheadAttention input; returns (L, N, E)."""
    L, N, D = z_lne.shape
    DF = params["w1"].shape[0]          # feedforward width (= 4*D)
    assert D % nhead == 0
    cdt = jnp.bfloat16 if use_bf16 else jnp.float32
    f32 = jnp.float32

    # batch-major, pad the batch to a multiple of the batch tile
    z = jnp.transpose(z_lne, (1, 0, 2)).astype(f32)          # (N, L, D)
    b_tile = max(1, min(b_tile, N))
    pad = (-N) % b_tile
    if pad:
        z = jnp.pad(z, ((0, pad), (0, 0), (0, 0)))
    n_pad = N + pad
    grid = (n_pad // b_tile,)                                # >= 2 and even for
    z2d = z.reshape(n_pad * L, D)                            # v7x megacore in demo

    # Weights pre-transposed to (in, out); Q|K|V fused; weights in compute dtype,
    # biases / LayerNorm params kept f32.
    wqkv = params["in_proj_w"].T.astype(cdt)                 # (D, 3D)
    bqkv = params["in_proj_b"].reshape(1, 3 * D).astype(f32)
    wo = params["out_proj_w"].T.astype(cdt)                  # (D, D)
    bo = params["out_proj_b"].reshape(1, D).astype(f32)
    ln1w = params["ln1_w"].reshape(1, D).astype(f32)
    ln1b = params["ln1_b"].reshape(1, D).astype(f32)
    ln2w = params["ln2_w"].reshape(1, D).astype(f32)
    ln2b = params["ln2_b"].reshape(1, D).astype(f32)
    w1 = params["w1"].T.astype(cdt)                          # (D, DF)
    b1 = params["b1"].reshape(1, DF).astype(f32)
    w2 = params["w2"].T.astype(cdt)                          # (DF, D)
    b2 = params["b2"].reshape(1, D).astype(f32)

    def const_spec(shape):
        return pl.BlockSpec(shape, lambda n: (0,) * len(shape))

    grid_spec = pltpu.PrefetchScalarGridSpec(
        num_scalar_prefetch=0,
        grid=grid,
        in_specs=[
            pl.BlockSpec((b_tile * L, D), lambda n: (n, 0)),   # z slab
            const_spec((1, D)), const_spec((1, D)),            # ln1 w, b
            const_spec((D, 3 * D)), const_spec((1, 3 * D)),    # wqkv, bqkv
            const_spec((D, D)), const_spec((1, D)),            # wo, bo
            const_spec((1, D)), const_spec((1, D)),            # ln2 w, b
            const_spec((D, DF)), const_spec((1, DF)),          # w1, b1
            const_spec((DF, D)), const_spec((1, D)),           # w2, b2
        ],
        out_specs=pl.BlockSpec((b_tile * L, D), lambda n: (n, 0)),
        scratch_shapes=[
            pltpu.VMEM((b_tile * L, 3 * D), jnp.float32),      # fused qkv
            pltpu.VMEM((b_tile * L, D), jnp.float32),          # attn output
        ],
    )

    # Explicit scoped-VMEM budget with headroom (stays below v7x's 64 MiB).
    csize = jnp.dtype(cdt).itemsize
    weight_bytes = (D * 3 * D + D * D + D * DF + DF * D) * csize
    block_bytes = 2 * (b_tile * L * D) * 4
    scratch_bytes = b_tile * L * 4 * D * 4
    live_bytes = (b_tile * L * (3 * D + DF + 4 * D) + 2 * L * L) * 4
    est = 2 * (weight_bytes + block_bytes) + scratch_bytes + live_bytes
    vmem_limit = int(min(max(2 * est, 8 * 2**20), 48 * 2**20))

    out2d = pl.pallas_call(
        functools.partial(encoder_layer_kernel, seq_len=L, nhead=nhead,
                          compute_dtype=cdt, approx_recip=use_bf16),
        out_shape=jax.ShapeDtypeStruct((n_pad * L, D), f32),
        grid_spec=grid_spec,
        compiler_params=pltpu.CompilerParams(
            dimension_semantics=("parallel",),
            vmem_limit_bytes=vmem_limit,
        ),
    )(z2d, ln1w, ln1b, wqkv, bqkv, wo, bo, ln2w, ln2b, w1, b1, w2, b2)

    out = out2d.reshape(n_pad, L, D)[:N]
    return jnp.transpose(out, (1, 0, 2)).astype(z_lne.dtype)


def reference_forward(z_lne, params, nhead):
    """Pure-JAX reference mirroring PyTorch semantics (dropout identity)."""
    L, N, D = z_lne.shape
    hd = D // nhead
    scale = 1.0 / math.sqrt(hd)

    def ln(x, w, b, eps=1e-5):
        mu = jnp.mean(x, axis=-1, keepdims=True)
        var = jnp.mean((x - mu) ** 2, axis=-1, keepdims=True)
        return (x - mu) / jnp.sqrt(var + eps) * w + b

    z = z_lne
    z1 = ln(z, params["ln1_w"], params["ln1_b"])
    wq = params["in_proj_w"][0 * D:1 * D]
    wk = params["in_proj_w"][1 * D:2 * D]
    wv = params["in_proj_w"][2 * D:3 * D]
    bq = params["in_proj_b"][0 * D:1 * D]
    bk = params["in_proj_b"][1 * D:2 * D]
    bv = params["in_proj_b"][2 * D:3 * D]
    q = (z1 @ wq.T + bq) * scale
    k = z1 @ wk.T + bk
    v = z1 @ wv.T + bv
    q = q.reshape(L, N, nhead, hd)
    k = k.reshape(L, N, nhead, hd)
    v = v.reshape(L, N, nhead, hd)
    s = jnp.einsum("lnhd,mnhd->nhlm", q, k)
    p = jax.nn.softmax(s, axis=-1)
    o = jnp.einsum("nhlm,mnhd->lnhd", p, v).reshape(L, N, D)
    attn = o @ params["out_proj_w"].T + params["out_proj_b"]
    z3 = attn + z
    z4 = ln(z3, params["ln2_w"], params["ln2_b"])
    h = jnp.maximum(z4 @ params["w1"].T + params["b1"], 0.0)
    ff = h @ params["w2"].T + params["b2"]
    return ff + z3


if __name__ == "__main__":
    L, N, D, NHEAD = 16, 8, 32, 4
    DF = D * 2 * 2          # dim_feedforward = d_model * 4

    key = jax.random.PRNGKey(0)
    keys = jax.random.split(key, 12)
    params = {
        "ln1_w": jnp.ones((D,), jnp.float32),
        "ln1_b": jnp.zeros((D,), jnp.float32),
        "in_proj_w": 0.05 * jax.random.normal(keys[0], (3 * D, D), jnp.float32),
        "in_proj_b": 0.01 * jax.random.normal(keys[1], (3 * D,), jnp.float32),
        "out_proj_w": 0.05 * jax.random.normal(keys[2], (D, D), jnp.float32),
        "out_proj_b": 0.01 * jax.random.normal(keys[3], (D,), jnp.float32),
        "ln2_w": jnp.ones((D,), jnp.float32),
        "ln2_b": jnp.zeros((D,), jnp.float32),
        "w1": 0.05 * jax.random.normal(keys[4], (DF, D), jnp.float32),
        "b1": 0.01 * jax.random.normal(keys[5], (DF,), jnp.float32),
        "w2": 0.05 * jax.random.normal(keys[6], (D, DF), jnp.float32),
        "b2": 0.01 * jax.random.normal(keys[7], (D,), jnp.float32),
    }

    z = jax.random.normal(keys[8], (L, N, D), jnp.float32)   # (seq, batch, d_model)
    ref = reference_forward(z, params, NHEAD)

    # f32 path: exactness check against the PyTorch-equivalent reference.
    out_f32 = jax.block_until_ready(
        transformer_encoder_layer(z, params, NHEAD, b_tile=4, use_bf16=False))
    assert out_f32.shape == ref.shape
    err = float(jnp.max(jnp.abs(out_f32 - ref)))
    assert jnp.allclose(out_f32, ref, atol=1e-4, rtol=1e-4), err

    # batch-padding path (N not divisible by the batch tile)
    z_odd = z[:, :6, :]
    ref_odd = reference_forward(z_odd, params, NHEAD)
    out_odd = jax.block_until_ready(
        transformer_encoder_layer(z_odd, params, NHEAD, b_tile=4, use_bf16=False))
    err_odd = float(jnp.max(jnp.abs(out_odd - ref_odd)))
    assert jnp.allclose(out_odd, ref_odd, atol=1e-4, rtol=1e-4), err_odd

    # bf16 fast path (bf16 matmul operands, f32 accumulation, approx reciprocal)
    out_bf16 = jax.block_until_ready(
        transformer_encoder_layer(z, params, NHEAD, b_tile=4, use_bf16=True))
    err16 = float(jnp.max(jnp.abs(out_bf16 - ref)))
    assert jnp.allclose(out_bf16, ref, atol=2e-2, rtol=2e-2), err16

    print("KERNEL_OK")
</pallas_src>

<mosaic_0001>
module attributes {stable_mosaic.version = 11 : i64} {
  func.func @encoder_layer_kernel(%arg0: i32, %arg1: memref<64x32xf32, #tpu.memory_space<vmem>>, %arg2: memref<1x32xf32, #tpu.memory_space<vmem>>, %arg3: memref<1x32xf32, #tpu.memory_space<vmem>>, %arg4: memref<32x96xf32, #tpu.memory_space<vmem>>, %arg5: memref<1x96xf32, #tpu.memory_space<vmem>>, %arg6: memref<32x32xf32, #tpu.memory_space<vmem>>, %arg7: memref<1x32xf32, #tpu.memory_space<vmem>>, %arg8: memref<1x32xf32, #tpu.memory_space<vmem>>, %arg9: memref<1x32xf32, #tpu.memory_space<vmem>>, %arg10: memref<32x128xf32, #tpu.memory_space<vmem>>, %arg11: memref<1x128xf32, #tpu.memory_space<vmem>>, %arg12: memref<128x32xf32, #tpu.memory_space<vmem>>, %arg13: memref<1x32xf32, #tpu.memory_space<vmem>>, %arg14: memref<64x32xf32, #tpu.memory_space<vmem>>, %arg15: memref<64x96xf32, #tpu.memory_space<vmem>>, %arg16: memref<64x32xf32, #tpu.memory_space<vmem>>) attributes {dimension_semantics = [#tpu.dimension_semantics<parallel>], iteration_bounds = array<i64: 2>, scalar_prefetch = 0 : i64, scratch_operands = 2 : i64, tpu.core_type = #tpu.core_type<tc>, window_params = [{transform_indices = @transform_0, window_bounds = array<i64: 64, 32>}, {pipeline_mode = #tpu.pipeline_mode<synchronous>, transform_indices = @transform_1, window_bounds = array<i64: 1, 32>}, {pipeline_mode = #tpu.pipeline_mode<synchronous>, transform_indices = @transform_2, window_bounds = array<i64: 1, 32>}, {pipeline_mode = #tpu.pipeline_mode<synchronous>, transform_indices = @transform_3, window_bounds = array<i64: 32, 96>}, {pipeline_mode = #tpu.pipeline_mode<synchronous>, transform_indices = @transform_4, window_bounds = array<i64: 1, 96>}, {pipeline_mode = #tpu.pipeline_mode<synchronous>, transform_indices = @transform_5, window_bounds = array<i64: 32, 32>}, {pipeline_mode = #tpu.pipeline_mode<synchronous>, transform_indices = @transform_6, window_bounds = array<i64: 1, 32>}, {pipeline_mode = #tpu.pipeline_mode<synchronous>, transform_indices = @transform_7, window_bounds = array<i64: 1, 32>}, {pipeline_mode = #tpu.pipeline_mode<synchronous>, transform_indices = @transform_8, window_bounds = array<i64: 1, 32>}, {pipeline_mode = #tpu.pipeline_mode<synchronous>, transform_indices = @transform_9, window_bounds = array<i64: 32, 128>}, {pipeline_mode = #tpu.pipeline_mode<synchronous>, transform_indices = @transform_10, window_bounds = array<i64: 1, 128>}, {pipeline_mode = #tpu.pipeline_mode<synchronous>, transform_indices = @transform_11, window_bounds = array<i64: 128, 32>}, {pipeline_mode = #tpu.pipeline_mode<synchronous>, transform_indices = @transform_12, window_bounds = array<i64: 1, 32>}, {transform_indices = @transform_13, window_bounds = array<i64: 64, 32>}]} {
    %c0 = arith.constant 0 : index
    %c0_0 = arith.constant 0 : index
    %0 = vector.load %arg1[%c0, %c0_0] : memref<64x32xf32, #tpu.memory_space<vmem>>, vector<64x32xf32>
    %c0_1 = arith.constant 0 : index
    %c0_2 = arith.constant 0 : index
    %1 = vector.load %arg2[%c0_1, %c0_2] : memref<1x32xf32, #tpu.memory_space<vmem>>, vector<1x32xf32>
    %c0_3 = arith.constant 0 : index
    %c0_4 = arith.constant 0 : index
    %2 = vector.load %arg3[%c0_3, %c0_4] : memref<1x32xf32, #tpu.memory_space<vmem>>, vector<1x32xf32>
    %cst = arith.constant dense<0.000000e+00> : vector<64xf32>
    %3 = vector.multi_reduction <add>, %0, %cst [1] : vector<64x32xf32> to vector<64xf32>
    %4 = vector.shape_cast %3 : vector<64xf32> to vector<64x1xf32>
    %cst_5 = arith.constant 3.200000e+01 : f32
    %5 = vector.broadcast %cst_5 : f32 to vector<64x1xf32>
    %6 = arith.divf %4, %5 : vector<64x1xf32>
    %7 = vector.broadcast %6 : vector<64x1xf32> to vector<64x32xf32>
    %8 = arith.subf %0, %7 : vector<64x32xf32>
    %9 = arith.mulf %8, %8 : vector<64x32xf32>
    %cst_6 = arith.constant dense<0.000000e+00> : vector<64xf32>
    %10 = vector.multi_reduction <add>, %9, %cst_6 [1] : vector<64x32xf32> to vector<64xf32>
    %11 = vector.shape_cast %10 : vector<64xf32> to vector<64x1xf32>
    %cst_7 = arith.constant 3.200000e+01 : f32
    %12 = vector.broadcast %cst_7 : f32 to vector<64x1xf32>
    %13 = arith.divf %11, %12 : vector<64x1xf32>
    %14 = vector.broadcast %6 : vector<64x1xf32> to vector<64x32xf32>
    %15 = arith.subf %0, %14 : vector<64x32xf32>
    %cst_8 = arith.constant 9.99999974E-6 : f32
    %16 = vector.broadcast %cst_8 : f32 to vector<64x1xf32>
    %17 = arith.addf %13, %16 : vector<64x1xf32>
    %18 = math.rsqrt %17 : vector<64x1xf32>
    %19 = vector.broadcast %18 : vector<64x1xf32> to vector<64x32xf32>
    %20 = arith.mulf %15, %19 : vector<64x32xf32>
    %21 = vector.broadcast %1 : vector<1x32xf32> to vector<64x32xf32>
    %22 = arith.mulf %20, %21 : vector<64x32xf32>
    %23 = vector.broadcast %2 : vector<1x32xf32> to vector<64x32xf32>
    %24 = arith.addf %22, %23 : vector<64x32xf32>
    %c0_9 = arith.constant 0 : index
    %c0_10 = arith.constant 0 : index
    %25 = vector.load %arg4[%c0_9, %c0_10] : memref<32x96xf32, #tpu.memory_space<vmem>>, vector<32x96xf32>
    %cst_11 = arith.constant dense<0.000000e+00> : vector<64x96xf32>
    %26 = tpu.matmul %24, %25, %cst_11 {dimension_numbers = #tpu.dot_dimension_numbers<[1], [0], [0], [1], [0, 0, 1, 1], [], []>} : vector<64x32xf32>, vector<32x96xf32>, vector<64x96xf32> -> vector<64x96xf32>
    %c0_12 = arith.constant 0 : index
    %c0_13 = arith.constant 0 : index
    %27 = vector.load %arg5[%c0_12, %c0_13] : memref<1x96xf32, #tpu.memory_space<vmem>>, vector<1x96xf32>
    %28 = vector.broadcast %27 : vector<1x96xf32> to vector<64x96xf32>
    %29 = arith.addf %26, %28 : vector<64x96xf32>
    %c0_14 = arith.constant 0 : index
    %c0_15 = arith.constant 0 : index
    %30 = vector.load %arg15[%c0_14, %c0_15] : memref<64x96xf32, #tpu.memory_space<vmem>>, vector<64x96xf32>
    tpu.vector_store %arg15[%c0_14, %c0_15], %29 {strides = array<i32>} : memref<64x96xf32, #tpu.memory_space<vmem>>, vector<64x96xf32>,
    %c0_16 = arith.constant 0 : index
    %c0_17 = arith.constant 0 : index
    %31 = vector.load %arg6[%c0_16, %c0_17] : memref<32x32xf32, #tpu.memory_space<vmem>>, vector<32x32xf32>
    %c0_i32 = arith.constant 0 : i32
    %c4_i32 = arith.constant 4 : i32
    %32 = arith.addi %c0_i32, %c4_i32 : i32
    %c1_i32 = arith.constant 1 : i32
    scf.for %arg17 = %c0_i32 to %32 step %c1_i32  : i32 {
      %c16_i32 = arith.constant 16 : i32
      %76 = arith.muli %arg17, %c16_i32 : i32
      %77 = tpu.assume_multiple %76, 8 : i32
      %78 = arith.index_cast %77 : i32 to index
      %c0_45 = arith.constant 0 : index
      %79 = vector.load %arg15[%78, %c0_45] : memref<64x96xf32, #tpu.memory_space<vmem>>, vector<16x96xf32>
      %cst_46 = arith.constant 0.000000e+00 : f32
      %80 = vector.broadcast %cst_46 : f32 to vector<16x32xf32>
      %81 = vector.extract_strided_slice %79 {offsets = [0, 0], sizes = [16, 8], strides = [1, 1]} : vector<16x96xf32> to vector<16x8xf32>
      %cst_47 = arith.constant 0.353553385 : f32
      %82 = vector.broadcast %cst_47 : f32 to vector<16x8xf32>
      %83 = arith.mulf %81, %82 : vector<16x8xf32>
      %84 = vector.extract_strided_slice %79 {offsets = [0, 32], sizes = [16, 8], strides = [1, 1]} : vector<16x96xf32> to vector<16x8xf32>
      %85 = vector.extract_strided_slice %79 {offsets = [0, 64], sizes = [16, 8], strides = [1, 1]} : vector<16x96xf32> to vector<16x8xf32>
      %cst_48 = arith.constant dense<0.000000e+00> : vector<16x16xf32>
      %86 = tpu.matmul %83, %84, %cst_48 {dimension_numbers = #tpu.dot_dimension_numbers<[1], [1], [0], [0], [0, 0, 1, 0], [], []>} : vector<16x8xf32>, vector<16x8xf32>, vector<16x16xf32> -> vector<16x16xf32>
      %cst_49 = arith.constant dense<0xFF800000> : vector<16xf32>
      %87 = vector.multi_reduction <maximumf>, %86, %cst_49 [1] : vector<16x16xf32> to vector<16xf32>
      %88 = vector.shape_cast %87 : vector<16xf32> to vector<16x1xf32>
      %89 = vector.broadcast %88 : vector<16x1xf32> to vector<16x16xf32>
      %90 = arith.subf %86, %89 : vector<16x16xf32>
      %91 = math.exp %90 : vector<16x16xf32>
      %cst_50 = arith.constant dense<0.000000e+00> : vector<16xf32>
      %92 = vector.multi_reduction <add>, %91, %cst_50 [1] : vector<16x16xf32> to vector<16xf32>
      %93 = vector.shape_cast %92 : vector<16xf32> to vector<16x1xf32>
      %94 = tpu.reciprocal %93 : vector<16x1xf32> -> vector<16x1xf32>
      %95 = vector.broadcast %94 : vector<16x1xf32> to vector<16x16xf32>
      %96 = arith.mulf %91, %95 : vector<16x16xf32>
      %cst_51 = arith.constant dense<0.000000e+00> : vector<16x8xf32>
      %97 = tpu.matmul %96, %85, %cst_51 {dimension_numbers = #tpu.dot_dimension_numbers<[1], [0], [0], [1], [0, 0, 1, 1], [], []>} : vector<16x16xf32>, vector<16x8xf32>, vector<16x8xf32> -> vector<16x8xf32>
      %98 = vector.extract_strided_slice %31 {offsets = [0, 0], sizes = [8, 32], strides = [1, 1]} : vector<32x32xf32> to vector<8x32xf32>
      %cst_52 = arith.constant dense<0.000000e+00> : vector<16x32xf32>
      %99 = tpu.matmul %97, %98, %cst_52 {dimension_numbers = #tpu.dot_dimension_numbers<[1], [0], [0], [1], [0, 0, 1, 1], [], []>} : vector<16x8xf32>, vector<8x32xf32>, vector<16x32xf32> -> vector<16x32xf32>
      %100 = arith.addf %80, %99 : vector<16x32xf32>
      %101 = vector.extract_strided_slice %79 {offsets = [0, 8], sizes = [16, 8], strides = [1, 1]} : vector<16x96xf32> to vector<16x8xf32>
      %cst_53 = arith.constant 0.353553385 : f32
      %102 = vector.broadcast %cst_53 : f32 to vector<16x8xf32>
      %103 = arith.mulf %101, %102 : vector<16x8xf32>
      %104 = vector.extract_strided_slice %79 {offsets = [0, 40], sizes = [16, 8], strides = [1, 1]} : vector<16x96xf32> to vector<16x8xf32>
      %105 = vector.extract_strided_slice %79 {offsets = [0, 72], sizes = [16, 8], strides = [1, 1]} : vector<16x96xf32> to vector<16x8xf32>
      %cst_54 = arith.constant dense<0.000000e+00> : vector<16x16xf32>
      %106 = tpu.matmul %103, %104, %cst_54 {dimension_numbers = #tpu.dot_dimension_numbers<[1], [1], [0], [0], [0, 0, 1, 0], [], []>} : vector<16x8xf32>, vector<16x8xf32>, vector<16x16xf32> -> vector<16x16xf32>
      %cst_55 = arith.constant dense<0xFF800000> : vector<16xf32>
      %107 = vector.multi_reduction <maximumf>, %106, %cst_55 [1] : vector<16x16xf32> to vector<16xf32>
      %108 = vector.shape_cast %107 : vector<16xf32> to vector<16x1xf32>
      %109 = vector.broadcast %108 : vector<16x1xf32> to vector<16x16xf32>
      %110 = arith.subf %106, %109 : vector<16x16xf32>
      %111 = math.exp %110 : vector<16x16xf32>
      %cst_56 = arith.constant dense<0.000000e+00> : vector<16xf32>
      %112 = vector.multi_reduction <add>, %111, %cst_56 [1] : vector<16x16xf32> to vector<16xf32>
      %113 = vector.shape_cast %112 : vector<16xf32> to vector<16x1xf32>
      %114 = tpu.reciprocal %113 : vector<16x1xf32> -> vector<16x1xf32>
      %115 = vector.broadcast %114 : vector<16x1xf32> to vector<16x16xf32>
      %116 = arith.mulf %111, %115 : vector<16x16xf32>
      %cst_57 = arith.constant dense<0.000000e+00> : vector<16x8xf32>
      %117 = tpu.matmul %116, %105, %cst_57 {dimension_numbers = #tpu.dot_dimension_numbers<[1], [0], [0], [1], [0, 0, 1, 1], [], []>} : vector<16x16xf32>, vector<16x8xf32>, vector<16x8xf32> -> vector<16x8xf32>
      %118 = vector.extract_strided_slice %31 {offsets = [8, 0], sizes = [8, 32], strides = [1, 1]} : vector<32x32xf32> to vector<8x32xf32>
      %cst_58 = arith.constant dense<0.000000e+00> : vector<16x32xf32>
      %119 = tpu.matmul %117, %118, %cst_58 {dimension_numbers = #tpu.dot_dimension_numbers<[1], [0], [0], [1], [0, 0, 1, 1], [], []>} : vector<16x8xf32>, vector<8x32xf32>, vector<16x32xf32> -> vector<16x32xf32>
      %120 = arith.addf %100, %119 : vector<16x32xf32>
      %121 = vector.extract_strided_slice %79 {offsets = [0, 16], sizes = [16, 8], strides = [1, 1]} : vector<16x96xf32> to vector<16x8xf32>
      %cst_59 = arith.constant 0.353553385 : f32
      %122 = vector.broadcast %cst_59 : f32 to vector<16x8xf32>
      %123 = arith.mulf %121, %122 : vector<16x8xf32>
      %124 = vector.extract_strided_slice %79 {offsets = [0, 48], sizes = [16, 8], strides = [1, 1]} : vector<16x96xf32> to vector<16x8xf32>
      %125 = vector.extract_strided_slice %79 {offsets = [0, 80], sizes = [16, 8], strides = [1, 1]} : vector<16x96xf32> to vector<16x8xf32>
      %cst_60 = arith.constant dense<0.000000e+00> : vector<16x16xf32>
      %126 = tpu.matmul %123, %124, %cst_60 {dimension_numbers = #tpu.dot_dimension_numbers<[1], [1], [0], [0], [0, 0, 1, 0], [], []>} : vector<16x8xf32>, vector<16x8xf32>, vector<16x16xf32> -> vector<16x16xf32>
      %cst_61 = arith.constant dense<0xFF800000> : vector<16xf32>
      %127 = vector.multi_reduction <maximumf>, %126, %cst_61 [1] : vector<16x16xf32> to vector<16xf32>
      %128 = vector.shape_cast %127 : vector<16xf32> to vector<16x1xf32>
      %129 = vector.broadcast %128 : vector<16x1xf32> to vector<16x16xf32>
      %130 = arith.subf %126, %129 : vector<16x16xf32>
      %131 = math.exp %130 : vector<16x16xf32>
      %cst_62 = arith.constant dense<0.000000e+00> : vector<16xf32>
      %132 = vector.multi_reduction <add>, %131, %cst_62 [1] : vector<16x16xf32> to vector<16xf32>
      %133 = vector.shape_cast %132 : vector<16xf32> to vector<16x1xf32>
      %134 = tpu.reciprocal %133 : vector<16x1xf32> -> vector<16x1xf32>
      %135 = vector.broadcast %134 : vector<16x1xf32> to vector<16x16xf32>
      %136 = arith.mulf %131, %135 : vector<16x16xf32>
      %cst_63 = arith.constant dense<0.000000e+00> : vector<16x8xf32>
      %137 = tpu.matmul %136, %125, %cst_63 {dimension_numbers = #tpu.dot_dimension_numbers<[1], [0], [0], [1], [0, 0, 1, 1], [], []>} : vector<16x16xf32>, vector<16x8xf32>, vector<16x8xf32> -> vector<16x8xf32>
      %138 = vector.extract_strided_slice %31 {offsets = [16, 0], sizes = [8, 32], strides = [1, 1]} : vector<32x32xf32> to vector<8x32xf32>
      %cst_64 = arith.constant dense<0.000000e+00> : vector<16x32xf32>
      %139 = tpu.matmul %137, %138, %cst_64 {dimension_numbers = #tpu.dot_dimension_numbers<[1], [0], [0], [1], [0, 0, 1, 1], [], []>} : vector<16x8xf32>, vector<8x32xf32>, vector<16x32xf32> -> vector<16x32xf32>
      %140 = arith.addf %120, %139 : vector<16x32xf32>
      %141 = vector.extract_strided_slice %79 {offsets = [0, 24], sizes = [16, 8], strides = [1, 1]} : vector<16x96xf32> to vector<16x8xf32>
      %cst_65 = arith.constant 0.353553385 : f32
      %142 = vector.broadcast %cst_65 : f32 to vector<16x8xf32>
      %143 = arith.mulf %141, %142 : vector<16x8xf32>
      %144 = vector.extract_strided_slice %79 {offsets = [0, 56], sizes = [16, 8], strides = [1, 1]} : vector<16x96xf32> to vector<16x8xf32>
      %145 = vector.extract_strided_slice %79 {offsets = [0, 88], sizes = [16, 8], strides = [1, 1]} : vector<16x96xf32> to vector<16x8xf32>
      %cst_66 = arith.constant dense<0.000000e+00> : vector<16x16xf32>
      %146 = tpu.matmul %143, %144, %cst_66 {dimension_numbers = #tpu.dot_dimension_numbers<[1], [1], [0], [0], [0, 0, 1, 0], [], []>} : vector<16x8xf32>, vector<16x8xf32>, vector<16x16xf32> -> vector<16x16xf32>
      %cst_67 = arith.constant dense<0xFF800000> : vector<16xf32>
      %147 = vector.multi_reduction <maximumf>, %146, %cst_67 [1] : vector<16x16xf32> to vector<16xf32>
      %148 = vector.shape_cast %147 : vector<16xf32> to vector<16x1xf32>
      %149 = vector.broadcast %148 : vector<16x1xf32> to vector<16x16xf32>
      %150 = arith.subf %146, %149 : vector<16x16xf32>
      %151 = math.exp %150 : vector<16x16xf32>
      %cst_68 = arith.constant dense<0.000000e+00> : vector<16xf32>
      %152 = vector.multi_reduction <add>, %151, %cst_68 [1] : vector<16x16xf32> to vector<16xf32>
      %153 = vector.shape_cast %152 : vector<16xf32> to vector<16x1xf32>
      %154 = tpu.reciprocal %153 : vector<16x1xf32> -> vector<16x1xf32>
      %155 = vector.broadcast %154 : vector<16x1xf32> to vector<16x16xf32>
      %156 = arith.mulf %151, %155 : vector<16x16xf32>
      %cst_69 = arith.constant dense<0.000000e+00> : vector<16x8xf32>
      %157 = tpu.matmul %156, %145, %cst_69 {dimension_numbers = #tpu.dot_dimension_numbers<[1], [0], [0], [1], [0, 0, 1, 1], [], []>} : vector<16x16xf32>, vector<16x8xf32>, vector<16x8xf32> -> vector<16x8xf32>
      %158 = vector.extract_strided_slice %31 {offsets = [24, 0], sizes = [8, 32], strides = [1, 1]} : vector<32x32xf32> to vector<8x32xf32>
      %cst_70 = arith.constant dense<0.000000e+00> : vector<16x32xf32>
      %159 = tpu.matmul %157, %158, %cst_70 {dimension_numbers = #tpu.dot_dimension_numbers<[1], [0], [0], [1], [0, 0, 1, 1], [], []>} : vector<16x8xf32>, vector<8x32xf32>, vector<16x32xf32> -> vector<16x32xf32>
      %160 = arith.addf %140, %159 : vector<16x32xf32>
      %161 = arith.index_cast %77 : i32 to index
      %c0_71 = arith.constant 0 : index
      %162 = vector.load %arg16[%161, %c0_71] : memref<64x32xf32, #tpu.memory_space<vmem>>, vector<16x32xf32>
      tpu.vector_store %arg16[%161, %c0_71], %160 {strides = array<i32>} : memref<64x32xf32, #tpu.memory_space<vmem>>, vector<16x32xf32>,
    }
    %c4_i32_18 = arith.constant 4 : i32
    %c0_19 = arith.constant 0 : index
    %c0_20 = arith.constant 0 : index
    %33 = vector.load %arg16[%c0_19, %c0_20] : memref<64x32xf32, #tpu.memory_space<vmem>>, vector<64x32xf32>
    %c0_21 = arith.constant 0 : index
    %c0_22 = arith.constant 0 : index
    %34 = vector.load %arg7[%c0_21, %c0_22] : memref<1x32xf32, #tpu.memory_space<vmem>>, vector<1x32xf32>
    %35 = vector.broadcast %34 : vector<1x32xf32> to vector<64x32xf32>
    %36 = arith.addf %33, %35 : vector<64x32xf32>
    %37 = arith.addf %36, %0 : vector<64x32xf32>
    %c0_23 = arith.constant 0 : index
    %c0_24 = arith.constant 0 : index
    %38 = vector.load %arg8[%c0_23, %c0_24] : memref<1x32xf32, #tpu.memory_space<vmem>>, vector<1x32xf32>
    %c0_25 = arith.constant 0 : index
    %c0_26 = arith.constant 0 : index
    %39 = vector.load %arg9[%c0_25, %c0_26] : memref<1x32xf32, #tpu.memory_space<vmem>>, vector<1x32xf32>
    %cst_27 = arith.constant dense<0.000000e+00> : vector<64xf32>
    %40 = vector.multi_reduction <add>, %37, %cst_27 [1] : vector<64x32xf32> to vector<64xf32>
    %41 = vector.shape_cast %40 : vector<64xf32> to vector<64x1xf32>
    %cst_28 = arith.constant 3.200000e+01 : f32
    %42 = vector.broadcast %cst_28 : f32 to vector<64x1xf32>
    %43 = arith.divf %41, %42 : vector<64x1xf32>
    %44 = vector.broadcast %43 : vector<64x1xf32> to vector<64x32xf32>
    %45 = arith.subf %37, %44 : vector<64x32xf32>
    %46 = arith.mulf %45, %45 : vector<64x32xf32>
    %cst_29 = arith.constant dense<0.000000e+00> : vector<64xf32>
    %47 = vector.multi_reduction <add>, %46, %cst_29 [1] : vector<64x32xf32> to vector<64xf32>
    %48 = vector.shape_cast %47 : vector<64xf32> to vector<64x1xf32>
    %cst_30 = arith.constant 3.200000e+01 : f32
    %49 = vector.broadcast %cst_30 : f32 to vector<64x1xf32>
    %50 = arith.divf %48, %49 : vector<64x1xf32>
    %51 = vector.broadcast %43 : vector<64x1xf32> to vector<64x32xf32>
    %52 = arith.subf %37, %51 : vector<64x32xf32>
    %cst_31 = arith.constant 9.99999974E-6 : f32
    %53 = vector.broadcast %cst_31 : f32 to vector<64x1xf32>
    %54 = arith.addf %50, %53 : vector<64x1xf32>
    %55 = math.rsqrt %54 : vector<64x1xf32>
    %56 = vector.broadcast %55 : vector<64x1xf32> to vector<64x32xf32>
    %57 = arith.mulf %52, %56 : vector<64x32xf32>
    %58 = vector.broadcast %38 : vector<1x32xf32> to vector<64x32xf32>
    %59 = arith.mulf %57, %58 : vector<64x32xf32>
    %60 = vector.broadcast %39 : vector<1x32xf32> to vector<64x32xf32>
    %61 = arith.addf %59, %60 : vector<64x32xf32>
    %c0_32 = arith.constant 0 : index
    %c0_33 = arith.constant 0 : index
    %62 = vector.load %arg10[%c0_32, %c0_33] : memref<32x128xf32, #tpu.memory_space<vmem>>, vector<32x128xf32>
    %cst_34 = arith.constant dense<0.000000e+00> : vector<64x128xf32>
    %63 = tpu.matmul %61, %62, %cst_34 {dimension_numbers = #tpu.dot_dimension_numbers<[1], [0], [0], [1], [0, 0, 1, 1], [], []>} : vector<64x32xf32>, vector<32x128xf32>, vector<64x128xf32> -> vector<64x128xf32>
    %c0_35 = arith.constant 0 : index
    %c0_36 = arith.constant 0 : index
    %64 = vector.load %arg11[%c0_35, %c0_36] : memref<1x128xf32, #tpu.memory_space<vmem>>, vector<1x128xf32>
    %65 = vector.broadcast %64 : vector<1x128xf32> to vector<64x128xf32>
    %66 = arith.addf %63, %65 : vector<64x128xf32>
    %cst_37 = arith.constant 0.000000e+00 : f32
    %67 = vector.broadcast %cst_37 : f32 to vector<64x128xf32>
    %68 = arith.maximumf %66, %67 : vector<64x128xf32>
    %c0_38 = arith.constant 0 : index
    %c0_39 = arith.constant 0 : index
    %69 = vector.load %arg12[%c0_38, %c0_39] : memref<128x32xf32, #tpu.memory_space<vmem>>, vector<128x32xf32>
    %cst_40 = arith.constant dense<0.000000e+00> : vector<64x32xf32>
    %70 = tpu.matmul %68, %69, %cst_40 {dimension_numbers = #tpu.dot_dimension_numbers<[1], [0], [0], [1], [0, 0, 1, 1], [], []>} : vector<64x128xf32>, vector<128x32xf32>, vector<64x32xf32> -> vector<64x32xf32>
    %c0_41 = arith.constant 0 : index
    %c0_42 = arith.constant 0 : index
    %71 = vector.load %arg13[%c0_41, %c0_42] : memref<1x32xf32, #tpu.memory_space<vmem>>, vector<1x32xf32>
    %72 = vector.broadcast %71 : vector<1x32xf32> to vector<64x32xf32>
    %73 = arith.addf %70, %72 : vector<64x32xf32>
    %74 = arith.addf %73, %37 : vector<64x32xf32>
    %c0_43 = arith.constant 0 : index
    %c0_44 = arith.constant 0 : index
    %75 = vector.load %arg14[%c0_43, %c0_44] : memref<64x32xf32, #tpu.memory_space<vmem>>, vector<64x32xf32>
    tpu.vector_store %arg14[%c0_43, %c0_44], %74 {strides = array<i32>} : memref<64x32xf32, #tpu.memory_space<vmem>>, vector<64x32xf32>,
    return
  }
  func.func @transform_0(%arg0: i32) -> (i32, i32) {
    %c0_i32 = arith.constant 0 : i32
    %c0_i32_0 = arith.constant 0 : i32
    return %arg0, %c0_i32 : i32, i32
  }
  func.func @transform_1(%arg0: i32) -> (i32, i32) {
    %c0_i32 = arith.constant 0 : i32
    %c0_i32_0 = arith.constant 0 : i32
    %c0_i32_1 = arith.constant 0 : i32
    return %c0_i32, %c0_i32_0 : i32, i32
  }
  func.func @transform_2(%arg0: i32) -> (i32, i32) {
    %c0_i32 = arith.constant 0 : i32
    %c0_i32_0 = arith.constant 0 : i32
    %c0_i32_1 = arith.constant 0 : i32
    return %c0_i32, %c0_i32_0 : i32, i32
  }
  func.func @transform_3(%arg0: i32) -> (i32, i32) {
    %c0_i32 = arith.constant 0 : i32
    %c0_i32_0 = arith.constant 0 : i32
    %c0_i32_1 = arith.constant 0 : i32
    return %c0_i32, %c0_i32_0 : i32, i32
  }
  func.func @transform_4(%arg0: i32) -> (i32, i32) {
    %c0_i32 = arith.constant 0 : i32
    %c0_i32_0 = arith.constant 0 : i32
    %c0_i32_1 = arith.constant 0 : i32
    return %c0_i32, %c0_i32_0 : i32, i32
  }
  func.func @transform_5(%arg0: i32) -> (i32, i32) {
    %c0_i32 = arith.constant 0 : i32
    %c0_i32_0 = arith.constant 0 : i32
    %c0_i32_1 = arith.constant 0 : i32
    return %c0_i32, %c0_i32_0 : i32, i32
  }
  func.func @transform_6(%arg0: i32) -> (i32, i32) {
    %c0_i32 = arith.constant 0 : i32
    %c0_i32_0 = arith.constant 0 : i32
    %c0_i32_1 = arith.constant 0 : i32
    return %c0_i32, %c0_i32_0 : i32, i32
  }
  func.func @transform_7(%arg0: i32) -> (i32, i32) {
    %c0_i32 = arith.constant 0 : i32
    %c0_i32_0 = arith.constant 0 : i32
    %c0_i32_1 = arith.constant 0 : i32
    return %c0_i32, %c0_i32_0 : i32, i32
  }
  func.func @transform_8(%arg0: i32) -> (i32, i32) {
    %c0_i32 = arith.constant 0 : i32
    %c0_i32_0 = arith.constant 0 : i32
    %c0_i32_1 = arith.constant 0 : i32
    return %c0_i32, %c0_i32_0 : i32, i32
  }
  func.func @transform_9(%arg0: i32) -> (i32, i32) {
    %c0_i32 = arith.constant 0 : i32
    %c0_i32_0 = arith.constant 0 : i32
    %c0_i32_1 = arith.constant 0 : i32
    return %c0_i32, %c0_i32_0 : i32, i32
  }
  func.func @transform_10(%arg0: i32) -> (i32, i32) {
    %c0_i32 = arith.constant 0 : i32
    %c0_i32_0 = arith.constant 0 : i32
    %c0_i32_1 = arith.constant 0 : i32
    return %c0_i32, %c0_i32_0 : i32, i32
  }
  func.func @transform_11(%arg0: i32) -> (i32, i32) {
    %c0_i32 = arith.constant 0 : i32
    %c0_i32_0 = arith.constant 0 : i32
    %c0_i32_1 = arith.constant 0 : i32
    return %c0_i32, %c0_i32_0 : i32, i32
  }
  func.func @transform_12(%arg0: i32) -> (i32, i32) {
    %c0_i32 = arith.constant 0 : i32
    %c0_i32_0 = arith.constant 0 : i32
    %c0_i32_1 = arith.constant 0 : i32
    return %c0_i32, %c0_i32_0 : i32, i32
  }
  func.func @transform_13(%arg0: i32) -> (i32, i32) {
    %c0_i32 = arith.constant 0 : i32
    %c0_i32_0 = arith.constant 0 : i32
    return %arg0, %c0_i32 : i32, i32
  }
}

</mosaic_0001>

<bundles_post_ra>
// kernel: tpu_custom_call.1
= control target key start
LH: loop header
LB: loop body
LE: loop exit
PB: predicated region body
PF: predicated region fallthrough
CT: control target
= control target key end

     0   :  { %s2956_s25 = smov 0   ;;  %s3514_s0 = inlined_call_operand.vmem [shape: f32[128,32], index: 0, kind: input, shape index: {}]   ;;  %s3515_s1 = inlined_call_operand.vmem [shape: f32[1,32], index: 1, kind: input, shape index: {}]   ;;  %s3516_s2 = inlined_call_operand.vmem [shape: f32[1,32], index: 2, kind: input, shape index: {}]   ;;  %s3517_s3 = inlined_call_operand.vmem [shape: f32[32,96], index: 3, kind: input, shape index: {}]   ;;  %s3518_s4 = inlined_call_operand.vmem [shape: f32[1,96], index: 4, kind: input, shape index: {}]   ;;  %s3519_s5 = inlined_call_operand.vmem [shape: f32[32,32], index: 5, kind: input, shape index: {}]   ;;  %s3520_s6 = inlined_call_operand.vmem [shape: f32[1,32], index: 6, kind: input, shape index: {}]   ;;  %s3521_s7 = inlined_call_operand.vmem [shape: f32[1,32], index: 7, kind: input, shape index: {}]   ;;  %s3522_s8 = inlined_call_operand.vmem [shape: f32[1,32], index: 8, kind: input, shape index: {}]   ;;  %s3523_s9 = inlined_call_operand.vmem [shape: f32[32,128], index: 9, kind: input, shape index: {}]   ;;  %s3524_s10 = inlined_call_operand.vmem [shape: f32[1,128], index: 10, kind: input, shape index: {}]   ;;  %s3525_s11 = inlined_call_operand.vmem [shape: f32[128,32], index: 11, kind: input, shape index: {}]   ;;  %s3526_s12 = inlined_call_operand.vmem [shape: f32[1,32], index: 12, kind: input, shape index: {}]   ;;  %s3527_s13 = inlined_call_operand.vmem [shape: f32[128,32], index: 13, kind: output, shape index: {}]  }
   0x1 LB: > { %s2408_s26 = sadd.s32 4294967295, %s2869_s25   ;;  %p2412_p0 = scmp.ge.s32.totalorder %s2869_s25, 1  ;;  %s2869_s25 = sphi %s2956_s25, %s23_s25  }
   0x2   : > { %p388_p1 = scmp.lt.s32.totalorder %s2869_s25, 3 }
   0x4   : > { %p389_p2 = pnand %p2412_p0, %p388_p1 }
   0x5   : > { %s2413_s27 = sshll.u32 (!%p389_p2), %s2408_s26, 3  ;;  %s3117_s26 = smov (!%p389_p2), 0  }
   0x6   : > { %392 = sbr.rel (%p389_p2) target bundleno = 3748 (0xea4), region = 72  ;;  %p433_p3 = scmp.lt.s32.totalorder (!%p389_p2), %s2413_s27, 15 }
   0xb   : > { %s3529_s27 = smov (!%p433_p3, %s2413_s27), 15  ;;  %vm454_vm0 = vcmask 261120   ;;  %v591_v56 = vld [vmem:[%s3517_s3 + $0x18] sm:$0xff]  ;;  %v590_v57 = vld [vmem:[%s3517_s3 + $0x10] sm:$0xff]  ;;  %v589_v58 = vld [vmem:[%s3517_s3 + $0x8] sm:$0xff]  ;;  %vm728_vm1 = vcmask 785408  }
   0xc   : > { %s2414_s28 = sshll.u32 %s3529_s27, 3  ;;  %2568 = vmatprep.subr.mxu0 %v591_v56  ;;  %2728 = vmatprep.subr.mxu1 %v591_v56  ;;  %v588_v59 = vld [vmem:[%s3517_s3] sm:$0xff] }
   0xd   : > { %s436_s14 = scalar_lea.vmem %s3514_s0, %s2414_s28  ;;  %s2970_s17 = scalar_lea.vmem %s3527_s13, %s2414_s28  ;;  %2569 = vmatpush3.msra.mxu0 %v591_v56  ;;  %2732 = vmatpush3.msra.mxu1 %v591_v56 }
   0xe   : > { %v2972_v0 = vld [vmem:[%s436_s14] sm:$0xff]  ;;  %v2974_v1 = vld [vmem:[%s436_s14 + $0x8] sm:$0xff]  ;;  %v2988_v8 = vld [vmem:[%s436_s14 + $0x10] sm:$0xff]  ;;  %2570 = vmatprep.subr.mxu0 %v590_v57  ;;  %2729 = vmatprep.subr.mxu1 %v590_v57 }
   0xf   : > { %v2976_v2 = vld [vmem:[%s436_s14 + $0x20] sm:$0xff]  ;;  %v455_v3 = vsel %vm454_vm0, %v2972_v0, 0.0  ;;  %v458_v4 = vsel %vm454_vm0, %v2974_v1, 0.0  ;;  %v2982_v5 = vld [vmem:[%s436_s14 + $0x28] sm:$0xff]  ;;  %v2990_v9 = vld [vmem:[%s436_s14 + $0x30] sm:$0xff]  ;;  %v461_v10 = vsel %vm454_vm0, %v2988_v8, 0.0  ;;  %2571 = vmatpush3.msra.mxu0 %v590_v57  ;;  %2733 = vmatpush3.msra.mxu1 %v590_v57 }
  0x10   : > { %456 = vadd.xlane.f32.xlu0 %v455_v3  ;;  %459 = vadd.xlane.f32.xlu1 %v458_v4  ;;  %v467_v6 = vsel %vm454_vm0, %v2976_v2, 0.0  ;;  %v470_v7 = vsel %vm454_vm0, %v2982_v5, 0.0  ;;  %v473_v11 = vsel %vm454_vm0, %v2990_v9, 0.0  ;;  %v2996_v12 = vld [vmem:[%s436_s14 + $0x18] sm:$0xff] }
  0x11   : > { %v2998_v13 = vld [vmem:[%s436_s14 + $0x38] sm:$0xff]  ;;  %v464_v14 = vsel %vm454_vm0, %v2996_v12, 0.0  ;;  %2572 = vmatprep.subr.mxu0 %v589_v58  ;;  %2730 = vmatprep.subr.mxu1 %v589_v58 }
  0x12   : > { %v476_v15 = vsel %vm454_vm0, %v2998_v13, 0.0  ;;  %2573 = vmatpush3.msra.mxu0 %v589_v58  ;;  %2734 = vmatpush3.msra.mxu1 %v589_v58 }
  0x13   : > { %2574 = vmatprep.subr.mxu0 %v588_v59  ;;  %2731 = vmatprep.subr.mxu1 %v588_v59 }
  0x14   : > { %468 = vadd.xlane.f32.xlu0 %v467_v6  ;;  %471 = vadd.xlane.f32.xlu1 %v470_v7 }
  0x15   : > { %2575 = vmatpush3.msra.mxu0 %v588_v59  ;;  %2735 = vmatpush3.msra.mxu1 %v588_v59 }
  0x18   : > { %462 = vadd.xlane.f32.xlu0 %v461_v10  ;;  %474 = vadd.xlane.f32.xlu1 %v473_v11 }
  0x1c   : > { %465 = vadd.xlane.f32.xlu0 %v464_v14  ;;  %477 = vadd.xlane.f32.xlu1 %v476_v15 }
  0x99   : > { %v457_v16 = vpop.xlane.xlu0 %456  ;;  %v460_v17 = vpop.xlane.xlu1 %459 }
  0x9a   : > { %v480_v18 = vmul.f32 0.03125, %v457_v16  ;;  %v481_v19 = vmul.f32 0.03125, %v460_v17 }
  0x9c   : > { %v3005_v20 = vsub.f32 %v2972_v0, %v480_v18  ;;  %v3008_v21 = vsub.f32 %v2974_v1, %v481_v19 }
  0x9d   : > { %v469_v22 = vpop.xlane.xlu0 %468  ;;  %v472_v23 = vpop.xlane.xlu1 %471 }
  0x9e   : > { %v484_v24 = vmul.f32 0.03125, %v469_v22  ;;  %v485_v25 = vmul.f32 0.03125, %v472_v23  ;;  %v496_v26 = vmul.f32 %v3005_v20, %v3005_v20  ;;  %v497_v27 = vmul.f32 %v3008_v21, %v3008_v21 }
  0xa0   : > { %v3015_v28 = vsub.f32 %v2976_v2, %v484_v24  ;;  %v3018_v29 = vsub.f32 %v2982_v5, %v485_v25  ;;  %v504_v30 = vsel %vm454_vm0, %v496_v26, 0.0  ;;  %v507_v33 = vsel %vm454_vm0, %v497_v27, 0.0 }
  0xa1   : > { %505 = vadd.xlane.f32.xlu0 %v504_v30  ;;  %v463_v31 = vpop.xlane.xlu0 %462  ;;  %v475_v32 = vpop.xlane.xlu1 %474 }
  0xa2   : > { %v482_v34 = vmul.f32 0.03125, %v463_v31  ;;  %v486_v35 = vmul.f32 0.03125, %v475_v32  ;;  %v500_v36 = vmul.f32 %v3015_v28, %v3015_v28  ;;  %v501_v37 = vmul.f32 %v3018_v29, %v3018_v29  ;;  %v2417_v32 = vld [vmem:[%s3515_s1] ss:$0 sm:$0xff] }
  0xa4   : > { %v3027_v38 = vsub.f32 %v2988_v8, %v482_v34  ;;  %v3030_v39 = vsub.f32 %v2990_v9, %v486_v35  ;;  %v516_v40 = vsel %vm454_vm0, %v500_v36, 0.0  ;;  %v519_v43 = vsel %vm454_vm0, %v501_v37, 0.0  ;;  %v2418_v35 = vld [vmem:[%s3516_s2] ss:$0 sm:$0xff] }
  0xa5   : > { %508 = vadd.xlane.f32.xlu0 %v507_v33  ;;  %517 = vadd.xlane.f32.xlu1 %v516_v40  ;;  %v466_v41 = vpop.xlane.xlu0 %465  ;;  %v478_v42 = vpop.xlane.xlu1 %477 }
  0xa6   : > { %v483_v44 = vmul.f32 0.03125, %v466_v41  ;;  %v487_v45 = vmul.f32 0.03125, %v478_v42  ;;  %v498_v46 = vmul.f32 %v3027_v38, %v3027_v38  ;;  %v502_v47 = vmul.f32 %v3030_v39, %v3030_v39 }
  0xa8   : > { %v3039_v48 = vsub.f32 %v2996_v12, %v483_v44  ;;  %v3042_v49 = vsub.f32 %v2998_v13, %v487_v45  ;;  %v510_v50 = vsel %vm454_vm0, %v498_v46, 0.0  ;;  %v522_v51 = vsel %vm454_vm0, %v502_v47, 0.0 }
  0xa9   : > { %520 = vadd.xlane.f32.xlu1 %v519_v43  ;;  %511 = vadd.xlane.f32.xlu0 %v510_v50 }
  0xaa   : > { %v499_v52 = vmul.f32 %v3039_v48, %v3039_v48  ;;  %v503_v53 = vmul.f32 %v3042_v49, %v3042_v49 }
  0xac   : > { %v513_v54 = vsel %vm454_vm0, %v499_v52, 0.0  ;;  %v525_v55 = vsel %vm454_vm0, %v503_v53, 0.0 }
  0xad   : > { %523 = vadd.xlane.f32.xlu1 %v522_v51  ;;  %514 = vadd.xlane.f32.xlu0 %v513_v54 }
  0xb1   : > { %526 = vadd.xlane.f32.xlu1 %v525_v55 }
 0x12a   : > { %v506_v60 = vpop.xlane.xlu0 %505 }
 0x12b   : > { %v528_v61 = vmul.f32 0.03125, %v506_v60 }
 0x12d   : > { %v536_v62 = vadd.f32 1e-05, %v528_v61 }
 0x12e   : > { %v518_v63 = vpop.xlane.xlu1 %517  ;;  %v509_v3 = vpop.xlane.xlu0 %508 }
 0x12f   : > { %2795 = vrsqrt.f32 %v536_v62  ;;  %v532_v4 = vmul.f32 0.03125, %v518_v63  ;;  %v529_v6 = vmul.f32 0.03125, %v509_v3  ;;  %v3094_v3 = vld [vmem:[%s3519_s5 + $0x8] sm:$0xff] }
 0x131   : > { %v540_v7 = vadd.f32 1e-05, %v532_v4  ;;  %v537_v10 = vadd.f32 1e-05, %v529_v6  ;;  %v3104_v4 = vld [vmem:[%s3519_s5 + $0x18] sm:$0xff] }
 0x132   : > { %v521_v11 = vpop.xlane.xlu1 %520  ;;  %v512_v14 = vpop.xlane.xlu0 %511  ;;  %v2419_v6 = vld [vmem:[%s3518_s4] ss:$0 sm:$0xff] }
 0x133   : > { %2797 = vrsqrt.f32 %v540_v7  ;;  %v533_v15 = vmul.f32 0.03125, %v521_v11  ;;  %v530_v16 = vmul.f32 0.03125, %v512_v14 }
 0x134   : > { %2799 = vrsqrt.f32 %v537_v10 }
 0x135   : > { %v541_v17 = vadd.f32 1e-05, %v533_v15  ;;  %v538_v18 = vadd.f32 1e-05, %v530_v16 }
 0x136   : > { %v524_v19 = vpop.xlane.xlu1 %523  ;;  %v515_v22 = vpop.xlane.xlu0 %514 }
 0x137   : > { %2801 = vrsqrt.f32 %v541_v17  ;;  %v534_v23 = vmul.f32 0.03125, %v524_v19  ;;  %v531_v24 = vmul.f32 0.03125, %v515_v22 }
 0x138   : > { %2803 = vrsqrt.f32 %v538_v18 }
 0x139   : > { %v542_v25 = vadd.f32 1e-05, %v534_v23  ;;  %v539_v26 = vadd.f32 1e-05, %v531_v24 }
 0x13a   : > { %v527_v27 = vpop.xlane.xlu1 %526 }
 0x13b   : > { %2805 = vrsqrt.f32 %v542_v25  ;;  %v535_v30 = vmul.f32 0.03125, %v527_v27 }
 0x13c   : > { %v2796_v31 = vpop.eup %2795  ;;  %2807 = vrsqrt.f32 %v539_v26 }
 0x13d   : > { %v543_v33 = vadd.f32 1e-05, %v535_v30  ;;  %v552_v34 = vmul.f32 %v2796_v31, %v3005_v20 }
 0x13f   : > { %2809 = vrsqrt.f32 %v543_v33  ;;  %v566_v36 = vmul.f32 %v2417_v32, %v552_v34 }
 0x140   : > { %v2798_v37 = vpop.eup %2797 }
 0x141   : > { %v2800_v40 = vpop.eup %2799  ;;  %v580_v41 = vadd.f32 %v2418_v35, %v566_v36  ;;  %v556_v42 = vmul.f32 %v2798_v37, %v3015_v28 }
 0x142   : > { %v553_v43 = vmul.f32 %v2800_v40, %v3008_v21 }
 0x143   : > { %2576 = vmatprep.mubr.msk.f32.mxu0 %vm454_vm0, %v580_v41  ;;  %v570_v44 = vmul.f32 %v2417_v32, %v556_v42 }
 0x144   : > { %v2802_v45 = vpop.eup %2801  ;;  %v567_v46 = vmul.f32 %v2417_v32, %v553_v43 }
 0x145   : > { %v2804_v47 = vpop.eup %2803  ;;  %v584_v20 = vadd.f32 %v2418_v35, %v570_v44  ;;  %v557_v50 = vmul.f32 %v2802_v45, %v3018_v29 }
 0x146   : > { %v581_v51 = vadd.f32 %v2418_v35, %v567_v46  ;;  %v554_v52 = vmul.f32 %v2804_v47, %v3027_v38 }
 0x147   : > { %2582 = vmatprep.mubr.msk.f32.mxu1 %vm454_vm0, %v584_v20  ;;  %v571_v53 = vmul.f32 %v2417_v32, %v557_v50 }
 0x148   : > { %v2806_v54 = vpop.eup %2805  ;;  %2577 = vmatmul.mubr.msk.f32.vlgmr.msra.gmra.mxu0 %vm454_vm0, %v581_v51  ;;  %v568_v28 = vmul.f32 %v2417_v32, %v554_v52 }
 0x149   : > { %v2808_v21 = vpop.eup %2807  ;;  %v585_v55 = vadd.f32 %v2418_v35, %v571_v53  ;;  %v558_v56 = vmul.f32 %v2806_v54, %v3030_v39 }
 0x14a   : > { %v582_v57 = vadd.f32 %v2418_v35, %v568_v28  ;;  %v555_v58 = vmul.f32 %v2808_v21, %v3039_v48  ;;  %v3089_v48 = vld [vmem:[%s3519_s5] sm:$0xff] }
 0x14b   : > { %2583 = vmatmul.mubr.msk.f32.vlgmr.msra.gmra.mxu1 %vm454_vm0, %v585_v55  ;;  %v572_v29 = vmul.f32 %v2417_v32, %v558_v56 }
 0x14c   : > { %v2810_v59 = vpop.eup %2809  ;;  %2579 = vmatprep.mubr.msk.f32.mxu0 %vm454_vm0, %v582_v57  ;;  %v569_v38 = vmul.f32 %v2417_v32, %v555_v58 }
 0x14d   : > { %v586_v60 = vadd.f32 %v2418_v35, %v572_v29  ;;  %v559_v61 = vmul.f32 %v2810_v59, %v3042_v49  ;;  %v3099_v49 = vld [vmem:[%s3519_s5 + $0x10] sm:$0xff] }
 0x14e   : > { %v583_v62 = vadd.f32 %v2418_v35, %v569_v38 }
 0x14f   : > { %2585 = vmatprep.mubr.msk.f32.mxu1 %vm454_vm0, %v586_v60  ;;  %v573_v63 = vmul.f32 %v2417_v32, %v559_v61 }
 0x150   : > { %2580 = vmatmul.mubr.msk.f32.gmra.mxu0 %vm454_vm0, %v583_v62 }
 0x151   : > { %v587_v39 = vadd.f32 %v2418_v35, %v573_v63 }
 0x153   : > { %2586 = vmatmul.mubr.msk.f32.gmra.mxu1 %vm454_vm0, %v587_v39 }
 0x208   : > { %v2578_v7 = vpop.f32.mrf.mxu0 }
 0x209   : > { %v695_v10 = vadd.f32 %v2578_v7, %v2419_v6 }
 0x20a   : > { %v689_v11 = vpop.f32.mrf.mxu0 }
 0x20b   : > { %730 = vst.msk [vmem:[#allocation2 + $0x8] sm:$0xff] %vm728_vm1, %v695_v10  ;;  %v690_v14 = vadd.f32 %v2419_v6, %v689_v11  ;;  %v2584_v15 = vpop.f32.mrf.mxu1 }
 0x20c   : > { %v715_v16 = vadd.f32 %v2584_v15, %v2419_v6 }
 0x20d   : > { %729 = vst.msk [vmem:[#allocation2] sm:$0xff] %vm728_vm1, %v690_v14  ;;  %v709_v17 = vpop.f32.mrf.mxu1 }
 0x20e   : > { %734 = vst.msk [vmem:[#allocation2 + $0x28] sm:$0xff] %vm728_vm1, %v715_v16  ;;  %v710_v18 = vadd.f32 %v2419_v6, %v709_v17 }
 0x210   : > { %733 = vst.msk [vmem:[#allocation2 + $0x20] sm:$0xff] %vm728_vm1, %v710_v18  ;;  %v2581_v19 = vpop.f32.mrf.mxu0 }
 0x211   : > { %v705_v22 = vadd.f32 %v2581_v19, %v2419_v6 }
 0x212   : > { %v699_v23 = vpop.f32.mrf.mxu0 }
 0x213   : > { %732 = vst.msk [vmem:[#allocation2 + $0x18] sm:$0xff] %vm728_vm1, %v705_v22  ;;  %v700_v24 = vadd.f32 %v2419_v6, %v699_v23  ;;  %v2587_v25 = vpop.f32.mrf.mxu1 }
 0x214   : > { %v725_v26 = vadd.f32 %v2587_v25, %v2419_v6 }
 0x215   : > { %731 = vst.msk [vmem:[#allocation2 + $0x10] sm:$0xff] %vm728_vm1, %v700_v24  ;;  %v719_v27 = vpop.f32.mrf.mxu1 }
 0x216   : > { %736 = vst.msk [vmem:[#allocation2 + $0x38] sm:$0xff] %vm728_vm1, %v725_v26  ;;  %v720_v30 = vadd.f32 %v2419_v6, %v719_v27 }
 0x218   : > { %735 = vst.msk [vmem:[#allocation2 + $0x30] sm:$0xff] %vm728_vm1, %v720_v30 }
 0x219 LB: >> { %s2428_s27 = sshll.u32 %s2873_s26, 4  ;;  %s2875_s29 = smov 96   ;;  %vm759_vm2 = vcmask 64512   ;;  %vm845_vm3 = vcmask 130048   ;;  %s2873_s26 = sphi %s3117_s26, %s746_s26  }
 0x21a   : >> { %s748_s28 = scalar_lea.vmem [#allocation2], %s2428_s27  ;;  %s2876_s30 = smov 64  }
 0x21b   : >> { %s2877_s14 = smov 120   ;;  %s2878_s15 = smov 88  }
 0x21c   : >> { %s2879_s16 = smov 56   ;;  %s2880_s18 = smov 80  }
 0x21d   : >> { %s2881_s19 = smov 112   ;;  %s2882_s20 = smov 72  }
 0x21e   : >> { %s2883_s21 = smov 104   ;;  %s2884_s22 = smov 48  }
 0x21f   : >> { %v3125_v31 = vld [vmem:[%s748_s28 + $0x8] sm:$0xff]  ;;  %v3127_v32 = vld [vmem:[%s748_s28] sm:$0xff]  ;;  %s2885_s23 = smov 40   ;;  %s1883_s24 = scalar_lea.vmem [#allocation3], %s2428_s27 }
 0x220   : >> { %757 = vrot.lane.b32.xlu0 %v3125_v31, %s2875_s29  ;;  %v3131_v33 = vmul.f32 0.35355338, %v3127_v32  ;;  %v3140_v36 = vmul.f32 0.35355338, %v3125_v31  ;;  %s746_s26 = sadd.s32 1, %s2873_s26  }
 0x221   : >> { %p743_p4 = scmp.ge.s32.totalorder %s746_s26, 4  }
 0x222   : >> { %2592 = vmatprep.mubr.msk.f32.mxu0 %vm759_vm2, %v3131_v33 }
 0x224   : >> { %755 = vrot.lane.b32.xlu0 %v3127_v32, %s2875_s29 }
 0x292   : >> { %v758_v34 = vpop.permute.xlu0 %757 }
 0x293   : >> { %2588 = vmatprep.subr.msk.mxu0 %vm759_vm2, %v758_v34 }
 0x294   : >> { %2589 = vmatpush3.xpose.msk.msra.mxu0 %vm759_vm2, %v758_v34 }
 0x296   : >> { %v756_v35 = vpop.permute.xlu0 %755 }
 0x297   : >> { %2590 = vmatprep.subr.msk.mxu0 %vm759_vm2, %v756_v35 }
 0x298   : >> { %2591 = vmatpush3.xpose.msk.msra.mxu0 %vm759_vm2, %v756_v35 }
 0x29b   : >> { %2593 = vmatmul.mubr.msk.f32.vlgmr.msra.gmra.mxu0 %vm759_vm2, %v3140_v36 }
 0x35b   : >> { %v2594_v37 = vpop.f32.mrf.mxu0 }
 0x35c   : >> { %v849_v42 = vsel %vm845_vm3, %v2594_v37, -inf }
 0x35d   : >> { %v836_v40 = vpop.f32.mrf.mxu0 }
 0x35e   : >> { %v846_v41 = vsel %vm845_vm3, %v836_v40, -inf }
 0x35f   : >> { %847 = vmax.xlane.f32.xlu1 %v846_v41 }
 0x363   : >> { %850 = vmax.xlane.f32.xlu1 %v849_v42 }
 0x3e8   : >> { %v848_v43 = vpop.xlane.xlu1 %847 }
 0x3e9   : >> { %v852_v44 = vsub.f32 %v836_v40, %v848_v43 }
 0x3eb   : >> { %v854_v45 = vmul.f32 1.442695, %v852_v44 }
 0x3ec   : >> { %v851_v46 = vpop.xlane.xlu1 %850 }
 0x3ed   : >> { %2811 = vpow2.f32 %v854_v45  ;;  %v853_v47 = vsub.f32 %v2594_v37, %v851_v46 }
 0x3ef   : >> { %v856_v20 = vmul.f32 1.442695, %v853_v47 }
 0x3f1   : >> { %2813 = vpow2.f32 %v856_v20 }
 0x3fa   : >> { %v2812_v50 = vpop.eup %2811 }
 0x3fb   : >> { %v858_v51 = vsel %vm845_vm3, %v2812_v50, 0.0 }
 0x3fc   : >> { %859 = vadd.xlane.f32.xlu0 %v858_v51 }
 0x3fe   : >> { %v2814_v52 = vpop.eup %2813 }
 0x3ff   : >> { %v861_v53 = vsel %vm845_vm3, %v2814_v52, 0.0 }
 0x400   : >> { %862 = vadd.xlane.f32.xlu1 %v861_v53 }
 0x411   : >> { %870 = vrot.lane.b32.xlu1 %v3125_v31, %s2876_s30 }
 0x412   : >> { %955 = vrot.lane.b32.xlu0 %v3131_v33, %s2877_s14 }
 0x415   : >> { %868 = vrot.lane.b32.xlu1 %v3127_v32, %s2876_s30 }
 0x419   : >> { %961 = vrot.lane.b32.xlu1 %v3125_v31, %s2878_s15 }
 0x41d   : >> { %959 = vrot.lane.b32.xlu1 %v3127_v32, %s2878_s15 }
 0x421   : >> { %957 = vrot.lane.b32.xlu1 %v3140_v36, %s2877_s14 }
 0x485   : >> { %v860_v54 = vpop.xlane.xlu0 %859 }
 0x486   : >> { %2815 = vrcp.f32 %v860_v54 }
 0x489   : >> { %v863_v28 = vpop.xlane.xlu1 %862  ;;  %v956_v38 = vpop.permute.xlu0 %955 }
 0x48a   : >> { %2817 = vrcp.f32 %v863_v28 }
 0x48d   : >> { %v871_v21 = vpop.permute.xlu1 %870 }
 0x48e   : >> { %2595 = vmatprep.subr.mxu1 %v871_v21 }
 0x48f   : >> { %2596 = vmatpush3.msra.mxu1 %v871_v21 }
 0x491   : >> { %v869_v55 = vpop.permute.xlu1 %868 }
 0x492   : >> { %2597 = vmatprep.subr.mxu1 %v869_v55 }
 0x493   : >> { %v2816_v56 = vpop.eup %2815  ;;  %2598 = vmatpush3.msra.mxu1 %v869_v55 }
 0x494   : >> { %v866_v57 = vmul.f32 %v2816_v56, %v2812_v50 }
 0x495   : >> { %v962_v58 = vpop.permute.xlu1 %961 }
 0x496   : >> { %2599 = vmatprep.mubr.msk.f32.mxu1 %vm845_vm3, %v866_v57  ;;  %2602 = vmatprep.subr.msk.mxu1 %vm759_vm2, %v962_v58 }
 0x497   : >> { %v2818_v29 = vpop.eup %2817 }
 0x498   : >> { %v867_v59 = vmul.f32 %v2818_v29, %v2814_v52 }
 0x499   : >> { %v960_v60 = vpop.permute.xlu1 %959 }
 0x49a   : >> { %2600 = vmatmul.mubr.msk.f32.vlgmr.msra.gmra.mxu1 %vm845_vm3, %v867_v59 }
 0x49b   : >> { %2603 = vmatpush3.xpose.msk.msra.mxu1 %vm759_vm2, %v962_v58  ;;  %2606 = vmatprep.mubr.msk.f32.mxu1 %vm759_vm2, %v956_v38 }
 0x49c   : >> { %2604 = vmatprep.subr.msk.mxu1 %vm759_vm2, %v960_v60 }
 0x49d   : >> { %v958_v61 = vpop.permute.xlu1 %957 }
 0x49f   : >> { %2605 = vmatpush3.xpose.msk.msra.mxu1 %vm759_vm2, %v960_v60 }
 0x4a0   : >> { %2621 = vmatprep.subr.mxu1 %v3089_v48 }
 0x4a2   : >> { %2607 = vmatmul.mubr.msk.f32.vlgmr.msra.gmra.mxu1 %vm759_vm2, %v958_v61 }
 0x4a3   : >> { %2622 = vmatpush3.msra.mxu1 %v3089_v48 }
 0x55a   : >> { %v2601_v62 = vpop.f32.mrf.mxu1 }
 0x55c   : >> { %v946_v63 = vpop.f32.mrf.mxu1 }
 0x55d   : >> { %2623 = vmatprep.mubr.msk.f32.mxu1 %vm759_vm2, %v946_v63 }
 0x55e   : >> { %2624 = vmatmul.mubr.msk.f32.vlgmr.msra.gmra.mxu1 %vm759_vm2, %v2601_v62 }
 0x562   : >> { %v2608_v39 = vpop.f32.mrf.mxu1 }
 0x563   : >> { %v1049_v6 = vsel %vm845_vm3, %v2608_v39, -inf }
 0x564   : >> { %1050 = vmax.xlane.f32.xlu0 %v1049_v6  ;;  %v1037_v7 = vpop.f32.mrf.mxu1 }
 0x565   : >> { %v1046_v10 = vsel %vm845_vm3, %v1037_v7, -inf }
 0x566   : >> { %1047 = vmax.xlane.f32.xlu1 %v1046_v10 }
 0x57a   : >> { %1068 = vrot.lane.b32.xlu0 %v3127_v32, %s2879_s16 }
 0x57e   : >> { %1317 = vrot.lane.b32.xlu0 %v3131_v33, %s2881_s19 }
 0x582   : >> { %1606 = vrot.lane.b32.xlu0 %v3125_v31, %s2882_s20 }
 0x586   : >> { %1600 = vrot.lane.b32.xlu0 %v3131_v33, %s2883_s21 }
 0x5ed   : >> { %v1051_v11 = vpop.xlane.xlu0 %1050 }
 0x5ee   : >> { %v1053_v14 = vsub.f32 %v2608_v39, %v1051_v11 }
 0x5ef   : >> { %v1048_v15 = vpop.xlane.xlu1 %1047 }
 0x5f0   : >> { %v1056_v16 = vmul.f32 1.442695, %v1053_v14  ;;  %v1052_v17 = vsub.f32 %v1037_v7, %v1048_v15 }
 0x5f1   : >> { %v1069_v30 = vpop.permute.xlu0 %1068 }
 0x5f2   : >> { %2819 = vpow2.f32 %v1056_v16  ;;  %v1054_v18 = vmul.f32 1.442695, %v1052_v17 }
 0x5f4   : >> { %2821 = vpow2.f32 %v1054_v18 }
 0x5f5   : >> { %v1318_v43 = vpop.permute.xlu0 %1317 }
 0x5f9   : >> { %v1607_v44 = vpop.permute.xlu0 %1606 }
 0x5fd   : >> { %v1601_v46 = vpop.permute.xlu0 %1600 }
 0x5ff   : >> { %v2820_v19 = vpop.eup %2819 }
 0x600   : >> { %v1061_v22 = vsel %vm845_vm3, %v2820_v19, 0.0 }
 0x601   : >> { %v2822_v23 = vpop.eup %2821  ;;  %1062 = vadd.xlane.f32.xlu1 %v1061_v22 }
 0x602   : >> { %v1058_v24 = vsel %vm845_vm3, %v2822_v23, 0.0 }
 0x605   : >> { %1059 = vadd.xlane.f32.xlu1 %v1058_v24 }
 0x616   : >> { %1070 = vrot.lane.b32.xlu1 %v3125_v31, %s2879_s16 }
 0x61a   : >> { %1323 = vrot.lane.b32.xlu1 %v3125_v31, %s2880_s18 }
 0x61e   : >> { %1321 = vrot.lane.b32.xlu1 %v3127_v32, %s2880_s18 }
 0x622   : >> { %1319 = vrot.lane.b32.xlu1 %v3140_v36, %s2881_s19 }
 0x626   : >> { %1604 = vrot.lane.b32.xlu1 %v3127_v32, %s2882_s20 }
 0x62a   : >> { %1602 = vrot.lane.b32.xlu1 %v3140_v36, %s2883_s21 }
 0x68a   : >> { %v1063_v25 = vpop.xlane.xlu1 %1062 }
 0x68b   : >> { %2823 = vrcp.f32 %v1063_v25 }
 0x68e   : >> { %v1060_v26 = vpop.xlane.xlu1 %1059 }
 0x68f   : >> { %2825 = vrcp.f32 %v1060_v26 }
 0x692   : >> { %v1071_v27 = vpop.permute.xlu1 %1070 }
 0x693   : >> { %2609 = vmatprep.subr.mxu0 %v1071_v27 }
 0x694   : >> { %2610 = vmatpush3.msra.mxu0 %v1071_v27 }
 0x695   : >> { %2611 = vmatprep.subr.mxu0 %v1069_v30 }
 0x696   : >> { %2612 = vmatpush3.msra.mxu0 %v1069_v30  ;;  %v1324_v36 = vpop.permute.xlu1 %1323 }
 0x697   : >> { %2616 = vmatprep.subr.mxu0 %v3094_v3 }
 0x698   : >> { %v2824_v34 = vpop.eup %2823 }
 0x699   : >> { %v1067_v33 = vmul.f32 %v2824_v34, %v2820_v19 }
 0x69a   : >> { %v1322_v41 = vpop.permute.xlu1 %1321 }
 0x69c   : >> { %v2826_v35 = vpop.eup %2825 }
 0x69d   : >> { %v1066_v37 = vmul.f32 %v2826_v35, %v2822_v23 }
 0x69e   : >> { %v1320_v45 = vpop.permute.xlu1 %1319 }
 0x69f   : >> { %2613 = vmatprep.mubr.msk.f32.mxu0 %vm845_vm3, %v1066_v37 }
 0x6a0   : >> { %2614 = vmatmul.mubr.msk.f32.vlgmr.msra.gmra.mxu0 %vm845_vm3, %v1067_v33  ;;  %v2625_v33 = vpop.f32.mrf.mxu1 }
 0x6a1   : >> { %2617 = vmatpush3.msra.mxu0 %v3094_v3 }
 0x6a2   : >> { %2626 = vmatprep.subr.msk.mxu0 %vm759_vm2, %v1324_v36  ;;  %v1605_v47 = vpop.permute.xlu1 %1604 }
 0x6a6   : >> { %v1603_v20 = vpop.permute.xlu1 %1602 }
 0x760   : >> { %v2615_v40 = vpop.f32.mrf.mxu0 }
 0x762   : >> { %v1146_v42 = vpop.f32.mrf.mxu0 }
 0x763   : >> { %2618 = vmatprep.mubr.msk.f32.mxu0 %vm759_vm2, %v1146_v42 }
 0x764   : >> { %2619 = vmatmul.mubr.msk.f32.vlgmr.msra.gmra.mxu0 %vm759_vm2, %v2615_v40 }
 0x765   : >> { %2627 = vmatpush3.xpose.msk.msra.mxu0 %vm759_vm2, %v1324_v36  ;;  %2630 = vmatprep.mubr.msk.f32.mxu0 %vm759_vm2, %v1318_v43  ;;  %v1308_v36 = vpop.f32.mrf.mxu1 }
 0x766   : >> { %2628 = vmatprep.subr.msk.mxu0 %vm759_vm2, %v1322_v41 }
 0x769   : >> { %2629 = vmatpush3.xpose.msk.msra.mxu0 %vm759_vm2, %v1322_v41 }
 0x76a   : >> { %2645 = vmatprep.subr.msk.mxu0 %vm759_vm2, %v1607_v44 }
 0x76c   : >> { %2631 = vmatmul.mubr.msk.f32.vlgmr.msra.gmra.mxu0 %vm759_vm2, %v1320_v45 }
 0x76d   : >> { %2646 = vmatpush3.xpose.msk.msra.mxu0 %vm759_vm2, %v1607_v44  ;;  %2649 = vmatprep.mubr.msk.f32.mxu0 %vm759_vm2, %v1601_v46 }
 0x76e   : >> { %2647 = vmatprep.subr.msk.mxu0 %vm759_vm2, %v1605_v47 }
 0x771   : >> { %2648 = vmatpush3.xpose.msk.msra.mxu0 %vm759_vm2, %v1605_v47 }
 0x774   : >> { %2650 = vmatmul.mubr.msk.f32.vlgmr.msra.gmra.mxu0 %vm759_vm2, %v1603_v20 }
 0x824   : >> { %v3199_v50 = vpop.f32.mrf.mxu0 }
 0x825   : >> { %v1314_v47 = vadd.f32 %v2625_v33, %v3199_v50 }
 0x826   : >> { %v3201_v51 = vpop.f32.mrf.mxu0 }
 0x82c   : >> { %v2632_v52 = vpop.f32.mrf.mxu0 }
 0x82d   : >> { %v1411_v53 = vsel %vm845_vm3, %v2632_v52, -inf }
 0x82e   : >> { %1412 = vmax.xlane.f32.xlu1 %v1411_v53  ;;  %v1399_v54 = vpop.f32.mrf.mxu0 }
 0x82f   : >> { %v1408_v28 = vsel %vm845_vm3, %v1399_v54, -inf }
 0x830   : >> { %1409 = vmax.xlane.f32.xlu0 %v1408_v28 }
 0x834   : >> { %v2651_v21 = vpop.f32.mrf.mxu0 }
 0x835   : >> { %v1694_v16 = vsel %vm845_vm3, %v2651_v21, -inf }
 0x836   : >> { %v1682_v55 = vpop.f32.mrf.mxu0 }
 0x837   : >> { %v1691_v56 = vsel %vm845_vm3, %v1682_v55, -inf }
 0x83f   : >> { %1432 = vrot.lane.b32.xlu1 %v3125_v31, %s2884_s22 }
 0x863   : >> { %1692 = vmax.xlane.f32.xlu1 %v1691_v56 }
 0x8b7   : >> { %v1413_v57 = vpop.xlane.xlu1 %1412 }
 0x8b8   : >> { %v1415_v58 = vsub.f32 %v2632_v52, %v1413_v57  ;;  %v1309_v52 = vadd.f32 %v1308_v36, %v3201_v51 }
 0x8b9   : >> { %v1410_v29 = vpop.xlane.xlu0 %1409 }
 0x8ba   : >> { %v1418_v59 = vmul.f32 1.442695, %v1415_v58  ;;  %v1414_v38 = vsub.f32 %v1399_v54, %v1410_v29  ;;  %v2461_v29 = vld [vmem:[%s3520_s6] ss:$0 sm:$0xff] (%p743_p4) }
 0x8bb   : >> { %v1433_v60 = vpop.permute.xlu1 %1432 }
 0x8bc   : >> { %2827 = vpow2.f32 %v1418_v59  ;;  %v1416_v61 = vmul.f32 1.442695, %v1414_v38  ;;  %2633 = vmatprep.subr.mxu1 %v1433_v60 }
 0x8bd   : >> { %2634 = vmatpush3.msra.mxu1 %v1433_v60 }
 0x8be   : >> { %2829 = vpow2.f32 %v1416_v61 }
 0x8c9   : >> { %v2828_v62 = vpop.eup %2827 }
 0x8ca   : >> { %v1423_v63 = vsel %vm845_vm3, %v2828_v62, 0.0 }
 0x8cb   : >> { %v2830_v39 = vpop.eup %2829  ;;  %1424 = vadd.xlane.f32.xlu0 %v1423_v63 }
 0x8cc   : >> { %v1420_v6 = vsel %vm845_vm3, %v2830_v39, 0.0 }
 0x8cf   : >> { %1421 = vadd.xlane.f32.xlu0 %v1420_v6 }
 0x8e5   : >> { %1430 = vrot.lane.b32.xlu0 %v3127_v32, %s2884_s22 }
 0x8ec   : >> { %v1693_v7 = vpop.xlane.xlu1 %1692 }
 0x8ed   : >> { %v1697_v10 = vsub.f32 %v1682_v55, %v1693_v7 }
 0x8ef   : >> { %v1699_v11 = vmul.f32 1.442695, %v1697_v10 }
 0x8f1   : >> { %2831 = vpow2.f32 %v1699_v11 }
 0x8fe   : >> { %v2832_v14 = vpop.eup %2831 }
 0x8ff   : >> { %v1703_v15 = vsel %vm845_vm3, %v2832_v14, 0.0 }
 0x900   : >> { %1704 = vadd.xlane.f32.xlu1 %v1703_v15 }
 0x904   : >> { %1695 = vmax.xlane.f32.xlu0 %v1694_v16 }
 0x911   : >> { %1715 = vrot.lane.b32.xlu1 %v3125_v31, %s2885_s23 }
 0x954   : >> { %v1425_v17 = vpop.xlane.xlu0 %1424 }
 0x955   : >> { %2833 = vrcp.f32 %v1425_v17 }
 0x958   : >> { %v1422_v18 = vpop.xlane.xlu0 %1421 }
 0x959   : >> { %2835 = vrcp.f32 %v1422_v18 }
 0x95c   : >> { %v1431_v19 = vpop.permute.xlu0 %1430 }
 0x95d   : >> { %2635 = vmatprep.subr.mxu1 %v1431_v19 }
 0x95e   : >> { %2636 = vmatpush3.msra.mxu1 %v1431_v19 }
 0x95f   : >> { %2640 = vmatprep.subr.mxu1 %v3099_v49 }
 0x962   : >> { %v2834_v22 = vpop.eup %2833 }
 0x963   : >> { %v1429_v25 = vmul.f32 %v2834_v22, %v2828_v62 }
 0x966   : >> { %v2836_v23 = vpop.eup %2835 }
 0x967   : >> { %v1428_v24 = vmul.f32 %v2836_v23, %v2830_v39 }
 0x969   : >> { %2637 = vmatprep.mubr.msk.f32.mxu1 %vm845_vm3, %v1428_v24 }
 0x96a   : >> { %2638 = vmatmul.mubr.msk.f32.vlgmr.msra.gmra.mxu1 %vm845_vm3, %v1429_v25 }
 0x96b   : >> { %2641 = vmatpush3.msra.mxu1 %v3099_v49 }
 0x989   : >> { %v1705_v35 = vpop.xlane.xlu1 %1704 }
 0x98d   : >> { %v1696_v31 = vpop.xlane.xlu0 %1695  ;;  %v1716_v37 = vpop.permute.xlu1 %1715 }
 0x98e   : >> { %v1698_v26 = vsub.f32 %v2651_v21, %v1696_v31  ;;  %2652 = vmatprep.subr.mxu1 %v1716_v37 }
 0x990   : >> { %v1701_v27 = vmul.f32 1.442695, %v1698_v26 }
 0x992   : >> { %2837 = vpow2.f32 %v1701_v27 }
 0x993   : >> { %2839 = vrcp.f32 %v1705_v35 }
 0x99f   : >> { %v2838_v30 = vpop.eup %2837 }
 0x9a0   : >> { %v1706_v34 = vsel %vm845_vm3, %v2838_v30, 0.0  ;;  %v2840_v40 = vpop.eup %2839 }
 0x9a1   : >> { %1707 = vadd.xlane.f32.xlu0 %v1706_v34  ;;  %v1711_v44 = vmul.f32 %v2840_v40, %v2832_v14 }
 0x9b7   : >> { %1713 = vrot.lane.b32.xlu0 %v3127_v32, %s2885_s23 }
 0xa2a   : >> { %v1708_v41 = vpop.xlane.xlu0 %1707  ;;  %v2639_v42 = vpop.f32.mrf.mxu1 }
 0xa2b   : >> { %2841 = vrcp.f32 %v1708_v41 }
 0xa2c   : >> { %v1508_v43 = vpop.f32.mrf.mxu1 }
 0xa2d   : >> { %2642 = vmatprep.mubr.msk.f32.mxu1 %vm759_vm2, %v1508_v43 }
 0xa2e   : >> { %2643 = vmatmul.mubr.msk.f32.vlgmr.msra.gmra.mxu1 %vm759_vm2, %v2639_v42  ;;  %v1714_v45 = vpop.permute.xlu0 %1713 }
 0xa2f   : >> { %2656 = vmatprep.mubr.msk.f32.mxu1 %vm845_vm3, %v1711_v44  ;;  %2653 = vmatpush3.msra.mxu1 %v1716_v37 }
 0xa30   : >> { %2654 = vmatprep.subr.mxu1 %v1714_v45 }
 0xa31   : >> { %2655 = vmatpush3.msra.mxu1 %v1714_v45 }
 0xa32   : >> { %2659 = vmatprep.subr.mxu1 %v3104_v4 }
 0xa38   : >> { %v2842_v32 = vpop.eup %2841 }
 0xa39   : >> { %v1712_v46 = vmul.f32 %v2842_v32, %v2838_v30 }
 0xa3b   : >> { %2657 = vmatmul.mubr.msk.f32.vlgmr.msra.gmra.mxu1 %vm845_vm3, %v1712_v46 }
 0xa3c   : >> { %2660 = vmatpush3.msra.mxu1 %v3104_v4 }
 0xaee   : >> { %v2644_v20 = vpop.f32.mrf.mxu1 }
 0xaef   : >> { %v1599_v53 = vadd.f32 %v2644_v20, %v1314_v47 }
 0xaf0   : >> { %v1589_v54 = vpop.f32.mrf.mxu1 }
 0xaf1   : >> { %v1598_v28 = vadd.f32 %v1589_v54, %v1309_v52 }
 0xafb   : >> { %v2658_v21 = vpop.f32.mrf.mxu1 }
 0xafd   : >> { %v1791_v55 = vpop.f32.mrf.mxu1 }
 0xafe   : >> { %2661 = vmatprep.mubr.msk.f32.mxu1 %vm759_vm2, %v1791_v55 }
 0xaff   : >> { %2662 = vmatmul.mubr.msk.f32.vlgmr.msra.gmra.mxu1 %vm759_vm2, %v2658_v21 }
 0xbbf   : >> { %v2663_v56 = vpop.f32.mrf.mxu1 }
 0xbc0   : >> { %v1882_v57 = vadd.f32 %v2663_v56, %v1599_v53  ;;  %745 = sbr.rel (!%p743_p4) target bundleno = 537 (0x219), region = 111 }
 0xbc1   : >> { %v1872_v58 = vpop.f32.mrf.mxu1 }
 0xbc2   : >> { %1885 = vst.msk [vmem:[%s1883_s24 + $0x8] sm:$0xff] %vm454_vm0, %v1882_v57  ;;  %v1881_v50 = vadd.f32 %v1872_v58, %v1598_v28 }
 0xbc4   : >> { %1884 = vst.msk [vmem:[%s1883_s24] sm:$0xff] %vm454_vm0, %v1881_v50 }
 0xbcb   : > { %v1886_v51 = vld [vmem:[#allocation3] sm:$0xff]  ;;  %v1888_v59 = vld [vmem:[#allocation3 + $0x10] sm:$0xff]  ;;  %v1887_v61 = vld [vmem:[#allocation3 + $0x8] sm:$0xff] }
 0xbcc   : > { %v1901_v38 = vadd.f32 %v2461_v29, %v1886_v51  ;;  %v1903_v60 = vadd.f32 %v2461_v29, %v1888_v59  ;;  %v1889_v62 = vld [vmem:[#allocation3 + $0x18] sm:$0xff]  ;;  %v1890_v63 = vld [vmem:[#allocation3 + $0x20] sm:$0xff]  ;;  %v1902_v39 = vadd.f32 %v2461_v29, %v1887_v61  ;;  %v1891_v10 = vld [vmem:[#allocation3 + $0x28] sm:$0xff] }
 0xbcd   : > { %v1904_v6 = vadd.f32 %v2461_v29, %v1889_v62  ;;  %v1905_v7 = vadd.f32 %v2461_v29, %v1890_v63  ;;  %v1906_v48 = vadd.f32 %v2461_v29, %v1891_v10  ;;  %v1892_v3 = vld [vmem:[#allocation3 + $0x30] sm:$0xff]  ;;  %v1893_v15 = vld [vmem:[#allocation3 + $0x38] sm:$0xff]  ;;  %v2052_v10 = vld [vmem:[%s3523_s9 + $0x8] sm:$0xff] }
 0xbce   : > { %v3240_v11 = vadd.f32 %v1901_v38, %v2972_v0  ;;  %v3243_v14 = vadd.f32 %v1903_v60, %v2988_v8  ;;  %v3246_v49 = vadd.f32 %v1902_v39, %v2974_v1  ;;  %v1907_v8 = vadd.f32 %v2461_v29, %v1892_v3  ;;  %v3342_v3 = vld [vmem:[%s3525_s11 + $0x78] sm:$0xff] }
 0xbcf   : > { %v3249_v4 = vadd.f32 %v1904_v6, %v2996_v12  ;;  %v3256_v0 = vadd.f32 %v1905_v7, %v2976_v2  ;;  %v3263_v18 = vadd.f32 %v1906_v48, %v2982_v5  ;;  %v1908_v19 = vadd.f32 %v2461_v29, %v1893_v15  ;;  %v2054_v6 = vld [vmem:[%s3523_s9 + $0x18] sm:$0xff]  ;;  %v2053_v7 = vld [vmem:[%s3523_s9 + $0x10] sm:$0xff]  ;;  %v2051_v48 = vld [vmem:[%s3523_s9] sm:$0xff]  ;;  %2736 = vmatprep.subr.mxu1 %v3342_v3 }
 0xbd0   : > { %v1919_v16 = vsel %vm454_vm0, %v3240_v11, 0.0  ;;  %v1925_v17 = vsel %vm454_vm0, %v3243_v14, 0.0  ;;  %v1922_v1 = vsel %vm454_vm0, %v3246_v49, 0.0  ;;  %v3270_v23 = vadd.f32 %v1907_v8, %v2990_v9  ;;  %2664 = vmatprep.subr.mxu0 %v2054_v6  ;;  %v3349_v15 = vld [vmem:[%s3525_s11 + $0x70] sm:$0xff]  ;;  %2752 = vmatpush3.msra.mxu1 %v3342_v3  ;;  %v3370_v8 = vld [vmem:[%s3525_s11 + $0x58] sm:$0xff] }
 0xbd1   : > { %1920 = vadd.xlane.f32.xlu0 %v1919_v16  ;;  %1926 = vadd.xlane.f32.xlu1 %v1925_v17  ;;  %v1928_v12 = vsel %vm454_vm0, %v3249_v4, 0.0  ;;  %v1931_v22 = vsel %vm454_vm0, %v3256_v0, 0.0  ;;  %v1934_v2 = vsel %vm454_vm0, %v3263_v18, 0.0  ;;  %v3273_v24 = vadd.f32 %v1908_v19, %v2998_v13  ;;  %v3356_v16 = vld [vmem:[%s3525_s11 + $0x68] sm:$0xff]  ;;  %v3363_v17 = vld [vmem:[%s3525_s11 + $0x60] sm:$0xff] }
 0xbd2   : > { %v1937_v5 = vsel %vm454_vm0, %v3270_v23, 0.0  ;;  %2665 = vmatpush3.msra.mxu0 %v2054_v6  ;;  %2737 = vmatprep.subr.mxu1 %v3349_v15  ;;  %v3391_v19 = vld [vmem:[%s3525_s11 + $0x40] sm:$0xff] }
 0xbd3   : > { %v1940_v25 = vsel %vm454_vm0, %v3273_v24, 0.0  ;;  %2666 = vmatprep.subr.mxu0 %v2053_v7  ;;  %2753 = vmatpush3.msra.mxu1 %v3349_v15 }
 0xbd4   : > { %2667 = vmatpush3.msra.mxu0 %v2053_v7  ;;  %2738 = vmatprep.subr.mxu1 %v3356_v16 }
 0xbd5   : > { %1923 = vadd.xlane.f32.xlu0 %v1922_v1  ;;  %1929 = vadd.xlane.f32.xlu1 %v1928_v12  ;;  %v3377_v1 = vld [vmem:[%s3525_s11 + $0x50] sm:$0xff]  ;;  %v3384_v12 = vld [vmem:[%s3525_s11 + $0x48] sm:$0xff] }
 0xbd6   : > { %2668 = vmatprep.subr.mxu0 %v2052_v10  ;;  %2754 = vmatpush3.msra.mxu1 %v3356_v16 }
 0xbd7   : > { %2669 = vmatpush3.msra.mxu0 %v2052_v10  ;;  %2739 = vmatprep.subr.mxu1 %v3363_v17 }
 0xbd8   : > { %2670 = vmatprep.subr.mxu0 %v2051_v48  ;;  %2755 = vmatpush3.msra.mxu1 %v3363_v17 }
 0xbd9   : > { %1932 = vadd.xlane.f32.xlu0 %v1931_v22  ;;  %1935 = vadd.xlane.f32.xlu1 %v1934_v2  ;;  %v3398_v22 = vld [vmem:[%s3525_s11 + $0x38] sm:$0xff]  ;;  %v3405_v2 = vld [vmem:[%s3525_s11 + $0x30] sm:$0xff] }
 0xbda   : > { %2671 = vmatpush3.msra.mxu0 %v2051_v48  ;;  %2740 = vmatprep.subr.mxu1 %v3370_v8 }
 0xbdb   : > { %2684 = vmatprep.subr.mxu0 %v3342_v3  ;;  %2756 = vmatpush3.msra.mxu1 %v3370_v8 }
 0xbdc   : > { %2741 = vmatprep.subr.mxu1 %v3377_v1 }
 0xbdd   : > { %1938 = vadd.xlane.f32.xlu0 %v1937_v5  ;;  %1941 = vadd.xlane.f32.xlu1 %v1940_v25  ;;  %v3412_v5 = vld [vmem:[%s3525_s11 + $0x28] sm:$0xff]  ;;  %v3419_v25 = vld [vmem:[%s3525_s11 + $0x20] sm:$0xff] }
 0xbde   : > { %2757 = vmatpush3.msra.mxu1 %v3377_v1 }
 0xbdf   : > { %2742 = vmatprep.subr.mxu1 %v3384_v12 }
 0xbe0   : > { %2758 = vmatpush3.msra.mxu1 %v3384_v12 }
 0xbe1   : > { %2743 = vmatprep.subr.mxu1 %v3391_v19 }
 0xbe2   : > { %2759 = vmatpush3.msra.mxu1 %v3391_v19 }
 0xbe3   : > { %2744 = vmatprep.subr.mxu1 %v3398_v22 }
 0xbe4   : > { %2760 = vmatpush3.msra.mxu1 %v3398_v22 }
 0xbe5   : > { %2745 = vmatprep.subr.mxu1 %v3405_v2 }
 0xbe6   : > { %2761 = vmatpush3.msra.mxu1 %v3405_v2 }
 0xbe7   : > { %2746 = vmatprep.subr.mxu1 %v3412_v5 }
 0xbe8   : > { %2762 = vmatpush3.msra.mxu1 %v3412_v5 }
 0xbe9   : > { %2747 = vmatprep.subr.mxu1 %v3419_v25 }
 0xbea   : > { %2763 = vmatpush3.msra.mxu1 %v3419_v25 }
 0xc5a   : > { %v1921_v31 = vpop.xlane.xlu0 %1920  ;;  %v1927_v26 = vpop.xlane.xlu1 %1926 }
 0xc5b   : > { %v1943_v27 = vmul.f32 0.03125, %v1921_v31  ;;  %v1945_v30 = vmul.f32 0.03125, %v1927_v26 }
 0xc5d   : > { %v3280_v9 = vsub.f32 %v3240_v11, %v1943_v27  ;;  %v3283_v13 = vsub.f32 %v3243_v14, %v1945_v30 }
 0xc5e   : > { %v1924_v34 = vpop.xlane.xlu0 %1923  ;;  %v1930_v35 = vpop.xlane.xlu1 %1929 }
 0xc5f   : > { %v1944_v37 = vmul.f32 0.03125, %v1924_v34  ;;  %v1946_v33 = vmul.f32 0.03125, %v1930_v35  ;;  %v1959_v36 = vmul.f32 %v3280_v9, %v3280_v9  ;;  %v1961_v40 = vmul.f32 %v3283_v13, %v3283_v13 }
 0xc61   : > { %v3290_v41 = vsub.f32 %v3246_v49, %v1944_v37  ;;  %v3293_v42 = vsub.f32 %v3249_v4, %v1946_v33  ;;  %v1967_v43 = vsel %vm454_vm0, %v1959_v36, 0.0  ;;  %v1973_v32 = vsel %vm454_vm0, %v1961_v40, 0.0 }
 0xc62   : > { %1968 = vadd.xlane.f32.xlu0 %v1967_v43  ;;  %v1933_v44 = vpop.xlane.xlu0 %1932  ;;  %v1936_v45 = vpop.xlane.xlu1 %1935 }
 0xc63   : > { %v1947_v46 = vmul.f32 0.03125, %v1933_v44  ;;  %v1948_v47 = vmul.f32 0.03125, %v1936_v45  ;;  %v1960_v20 = vmul.f32 %v3290_v41, %v3290_v41  ;;  %v1962_v52 = vmul.f32 %v3293_v42, %v3293_v42 }
 0xc65   : > { %v3302_v53 = vsub.f32 %v3256_v0, %v1947_v46  ;;  %v3305_v54 = vsub.f32 %v3263_v18, %v1948_v47  ;;  %v1970_v28 = vsel %vm454_vm0, %v1960_v20, 0.0  ;;  %v1976_v56 = vsel %vm454_vm0, %v1962_v52, 0.0 }
 0xc66   : > { %1974 = vadd.xlane.f32.xlu0 %v1973_v32  ;;  %1971 = vadd.xlane.f32.xlu1 %v1970_v28  ;;  %v1939_v21 = vpop.xlane.xlu0 %1938  ;;  %v1942_v55 = vpop.xlane.xlu1 %1941 }
 0xc67   : > { %v1949_v57 = vmul.f32 0.03125, %v1939_v21  ;;  %v1950_v58 = vmul.f32 0.03125, %v1942_v55  ;;  %v1963_v50 = vmul.f32 %v3302_v53, %v3302_v53  ;;  %v1964_v51 = vmul.f32 %v3305_v54, %v3305_v54 }
 0xc69   : > { %v3314_v29 = vsub.f32 %v3270_v23, %v1949_v57  ;;  %v3317_v59 = vsub.f32 %v3273_v24, %v1950_v58  ;;  %v1979_v38 = vsel %vm454_vm0, %v1963_v50, 0.0  ;;  %v1982_v60 = vsel %vm454_vm0, %v1964_v51, 0.0  ;;  %v2462_v50 = vld [vmem:[%s3521_s7] ss:$0 sm:$0xff] }
 0xc6a   : > { %1977 = vadd.xlane.f32.xlu1 %v1976_v56  ;;  %1980 = vadd.xlane.f32.xlu0 %v1979_v38 }
 0xc6b   : > { %v1965_v61 = vmul.f32 %v3314_v29, %v3314_v29  ;;  %v1966_v62 = vmul.f32 %v3317_v59, %v3317_v59 }
 0xc6d   : > { %v1985_v63 = vsel %vm454_vm0, %v1965_v61, 0.0  ;;  %v1988_v39 = vsel %vm454_vm0, %v1966_v62, 0.0 }
 0xc6e   : > { %1983 = vadd.xlane.f32.xlu1 %v1982_v60  ;;  %1986 = vadd.xlane.f32.xlu0 %v1985_v63  ;;  %v2463_v60 = vld [vmem:[%s3522_s8] ss:$0 sm:$0xff] }
 0xc72   : > { %1989 = vadd.xlane.f32.xlu1 %v1988_v39 }
 0xceb   : > { %v1969_v31 = vpop.xlane.xlu0 %1968 }
 0xcec   : > { %v1991_v26 = vmul.f32 0.03125, %v1969_v31 }
 0xcee   : > { %v1999_v27 = vadd.f32 1e-05, %v1991_v26 }
 0xcef   : > { %v1972_v30 = vpop.xlane.xlu1 %1971  ;;  %v1975_v34 = vpop.xlane.xlu0 %1974 }
 0xcf0   : > { %2843 = vrsqrt.f32 %v1999_v27  ;;  %v1992_v35 = vmul.f32 0.03125, %v1972_v30  ;;  %v1993_v37 = vmul.f32 0.03125, %v1975_v34 }
 0xcf2   : > { %v2000_v33 = vadd.f32 1e-05, %v1992_v35  ;;  %v2001_v36 = vadd.f32 1e-05, %v1993_v37 }
 0xcf3   : > { %v1978_v40 = vpop.xlane.xlu1 %1977  ;;  %v1981_v43 = vpop.xlane.xlu0 %1980 }
 0xcf4   : > { %2845 = vrsqrt.f32 %v2000_v33  ;;  %v1994_v44 = vmul.f32 0.03125, %v1978_v40  ;;  %v1995_v45 = vmul.f32 0.03125, %v1981_v43 }
 0xcf5   : > { %2847 = vrsqrt.f32 %v2001_v36 }
 0xcf6   : > { %v2002_v32 = vadd.f32 1e-05, %v1994_v44  ;;  %v2003_v46 = vadd.f32 1e-05, %v1995_v45 }
 0xcf7   : > { %v1984_v47 = vpop.xlane.xlu1 %1983  ;;  %v1987_v20 = vpop.xlane.xlu0 %1986 }
 0xcf8   : > { %2849 = vrsqrt.f32 %v2002_v32  ;;  %v1996_v52 = vmul.f32 0.03125, %v1984_v47  ;;  %v1997_v28 = vmul.f32 0.03125, %v1987_v20 }
 0xcf9   : > { %2851 = vrsqrt.f32 %v2003_v46 }
 0xcfa   : > { %v2004_v21 = vadd.f32 1e-05, %v1996_v52  ;;  %v2005_v55 = vadd.f32 1e-05, %v1997_v28 }
 0xcfb   : > { %v1990_v56 = vpop.xlane.xlu1 %1989 }
 0xcfc   : > { %2853 = vrsqrt.f32 %v2004_v21  ;;  %v1998_v57 = vmul.f32 0.03125, %v1990_v56 }
 0xcfd   : > { %v2844_v58 = vpop.eup %2843  ;;  %2855 = vrsqrt.f32 %v2005_v55 }
 0xcfe   : > { %v2006_v51 = vadd.f32 1e-05, %v1998_v57  ;;  %v2015_v38 = vmul.f32 %v2844_v58, %v3280_v9 }
 0xd00   : > { %2857 = vrsqrt.f32 %v2006_v51  ;;  %v2029_v61 = vmul.f32 %v2462_v50, %v2015_v38 }
 0xd01   : > { %v2846_v62 = vpop.eup %2845 }
 0xd02   : > { %v2848_v63 = vpop.eup %2847  ;;  %v2043_v39 = vadd.f32 %v2463_v60, %v2029_v61  ;;  %v2016_v6 = vmul.f32 %v2846_v62, %v3290_v41 }
 0xd03   : > { %v2017_v7 = vmul.f32 %v2848_v63, %v3283_v13 }
 0xd04   : > { %2672 = vmatprep.mubr.msk.f32.mxu0 %vm454_vm0, %v2043_v39  ;;  %v2030_v10 = vmul.f32 %v2462_v50, %v2016_v6  ;;  %v2473_v39 = vld [vmem:[%s3526_s12] ss:$0 sm:$0xff] }
 0xd05   : > { %v2850_v48 = vpop.eup %2849  ;;  %v2031_v31 = vmul.f32 %v2462_v50, %v2017_v7 }
 0xd06   : > { %v2852_v26 = vpop.eup %2851  ;;  %v2044_v9 = vadd.f32 %v2463_v60, %v2030_v10  ;;  %v2018_v27 = vmul.f32 %v2850_v48, %v3293_v42 }
 0xd07   : > { %v2045_v30 = vadd.f32 %v2463_v60, %v2031_v31  ;;  %v2019_v34 = vmul.f32 %v2852_v26, %v3302_v53 }
 0xd08   : > { %2673 = vmatmul.mubr.msk.f32.vlgmr.msra.gmra.mxu0 %vm454_vm0, %v2044_v9  ;;  %v2032_v35 = vmul.f32 %v2462_v50, %v2018_v27 }
 0xd09   : > { %v2854_v37 = vpop.eup %2853  ;;  %2675 = vmatprep.mubr.msk.f32.mxu0 %vm454_vm0, %v2045_v30  ;;  %v2033_v41 = vmul.f32 %v2462_v50, %v2019_v34  ;;  %2685 = vmatpush3.msra.mxu0 %v3342_v3 }
 0xd0a   : > { %v2856_v13 = vpop.eup %2855  ;;  %v2046_v33 = vadd.f32 %v2463_v60, %v2032_v35  ;;  %v2020_v36 = vmul.f32 %v2854_v37, %v3305_v54  ;;  %2686 = vmatprep.subr.mxu0 %v3349_v15 }
 0xd0b   : > { %v2047_v40 = vadd.f32 %v2463_v60, %v2033_v41  ;;  %v2021_v42 = vmul.f32 %v2856_v13, %v3314_v29  ;;  %2687 = vmatpush3.msra.mxu0 %v3349_v15 }
 0xd0c   : > { %2676 = vmatmul.mubr.msk.f32.gmra.mxu0 %vm454_vm0, %v2046_v33  ;;  %v2034_v53 = vmul.f32 %v2462_v50, %v2020_v36  ;;  %2688 = vmatprep.subr.mxu0 %v3356_v16 }
 0xd0d   : > { %v2858_v43 = vpop.eup %2857  ;;  %2678 = vmatprep.mubr.msk.f32.mxu0 %vm454_vm0, %v2047_v40  ;;  %v2035_v3 = vmul.f32 %v2462_v50, %v2021_v42  ;;  %2689 = vmatpush3.msra.mxu0 %v3356_v16  ;;  %v2201_v16 = vld [vmem:[%s3525_s11 + $0x10] sm:$0xff] }
 0xd0e   : > { %v2048_v44 = vadd.f32 %v2463_v60, %v2034_v53  ;;  %v2022_v54 = vmul.f32 %v2858_v43, %v3317_v59  ;;  %2690 = vmatprep.subr.mxu0 %v3363_v17  ;;  %v2202_v59 = vld [vmem:[%s3525_s11 + $0x18] sm:$0xff] }
 0xd0f   : > { %v2049_v45 = vadd.f32 %v2463_v60, %v2035_v3  ;;  %2691 = vmatpush3.msra.mxu0 %v3363_v17  ;;  %2748 = vmatprep.subr.mxu1 %v2202_v59  ;;  %v2200_v17 = vld [vmem:[%s3525_s11 + $0x8] sm:$0xff] }
 0xd10   : > { %2679 = vmatmul.mubr.msk.f32.gmra.mxu0 %vm454_vm0, %v2048_v44  ;;  %v2036_v29 = vmul.f32 %v2462_v50, %v2022_v54  ;;  %2692 = vmatprep.subr.mxu0 %v3370_v8 }
 0xd11   : > { %2681 = vmatprep.mubr.msk.f32.mxu0 %vm454_vm0, %v2049_v45  ;;  %2693 = vmatpush3.msra.mxu0 %v3370_v8  ;;  %v2199_v8 = vld [vmem:[%s3525_s11] sm:$0xff] }
 0xd12   : > { %v2050_v15 = vadd.f32 %v2463_v60, %v2036_v29  ;;  %2694 = vmatprep.subr.mxu0 %v3377_v1  ;;  %2764 = vmatpush3.msra.mxu1 %v2202_v59 }
 0xd13   : > { %2695 = vmatpush3.msra.mxu0 %v3377_v1  ;;  %2749 = vmatprep.subr.mxu1 %v2201_v16  ;;  %v2464_v1 = vld [vmem:[%s3524_s10] ss:$0 sm:$0xff] }
 0xd14   : > { %2682 = vmatmul.mubr.msk.f32.gmra.mxu0 %vm454_vm0, %v2050_v15  ;;  %2696 = vmatprep.subr.mxu0 %v3384_v12 }
 0xd15   : > { %2697 = vmatpush3.msra.mxu0 %v3384_v12  ;;  %2765 = vmatpush3.msra.mxu1 %v2201_v16 }
 0xd16   : > { %2698 = vmatprep.subr.mxu0 %v3391_v19  ;;  %2750 = vmatprep.subr.mxu1 %v2200_v17 }
 0xd17   : > { %2699 = vmatpush3.msra.mxu0 %v3391_v19  ;;  %2766 = vmatpush3.msra.mxu1 %v2200_v17 }
 0xd18   : > { %2700 = vmatprep.subr.mxu0 %v3398_v22  ;;  %2751 = vmatprep.subr.mxu1 %v2199_v8 }
 0xd19   : > { %2701 = vmatpush3.msra.mxu0 %v3398_v22  ;;  %2767 = vmatpush3.msra.mxu1 %v2199_v8 }
 0xd1a   : > { %2702 = vmatprep.subr.mxu0 %v3405_v2 }
 0xd1b   : > { %2703 = vmatpush3.msra.mxu0 %v3405_v2 }
 0xd1c   : > { %2704 = vmatprep.subr.mxu0 %v3412_v5 }
 0xd1d   : > { %2705 = vmatpush3.msra.mxu0 %v3412_v5 }
 0xd1e   : > { %2706 = vmatprep.subr.mxu0 %v3419_v25 }
 0xd1f   : > { %2707 = vmatpush3.msra.mxu0 %v3419_v25 }
 0xd20   : > { %2708 = vmatprep.subr.mxu0 %v2202_v59 }
 0xd21   : > { %2709 = vmatpush3.msra.mxu0 %v2202_v59 }
 0xd22   : > { %2710 = vmatprep.subr.mxu0 %v2201_v16 }
 0xd23   : > { %2711 = vmatpush3.msra.mxu0 %v2201_v16 }
 0xd24   : > { %2712 = vmatprep.subr.mxu0 %v2200_v17 }
 0xd25   : > { %2713 = vmatpush3.msra.mxu0 %v2200_v17 }
 0xd26   : > { %2714 = vmatprep.subr.mxu0 %v2199_v8 }
 0xd27   : > { %2715 = vmatpush3.msra.mxu0 %v2199_v8 }
 0xdc8   : > { %v2674_v12 = vpop.f32.mrf.mxu0 }
 0xdc9   : > { %v2158_v19 = vadd.f32 %v2674_v12, %v2464_v1 }
 0xdca   : > { %v2152_v22 = vpop.f32.mrf.mxu0 }
 0xdcb   : > { %v2153_v2 = vadd.f32 %v2464_v1, %v2152_v22  ;;  %v2192_v32 = vmax.f32 %v2158_v19, 0.0 }
 0xdcc   : > { %v2677_v5 = vpop.f32.mrf.mxu0 }
 0xdcd   : > { %v2191_v25 = vmax.f32 %v2153_v2, 0.0  ;;  %v2168_v46 = vadd.f32 %v2677_v5, %v2464_v1 }
 0xdce   : > { %v2162_v47 = vpop.f32.mrf.mxu0 }
 0xdcf   : > { %2716 = vmatprep.mubr.f32.mxu0 %v2191_v25  ;;  %v2163_v20 = vadd.f32 %v2464_v1, %v2162_v47  ;;  %v2194_v21 = vmax.f32 %v2168_v46, 0.0 }
 0xdd0   : > { %v2680_v52 = vpop.f32.mrf.mxu0  ;;  %2717 = vmatmul.mubr.f32.vlgmr.msra.gmra.mxu0 %v2192_v32 }
 0xdd1   : > { %v2193_v28 = vmax.f32 %v2163_v20, 0.0  ;;  %v2178_v55 = vadd.f32 %v2680_v52, %v2464_v1 }
 0xdd2   : > { %v2172_v56 = vpop.f32.mrf.mxu0 }
 0xdd3   : > { %v2173_v57 = vadd.f32 %v2464_v1, %v2172_v56  ;;  %2719 = vmatprep.mubr.f32.mxu1 %v2193_v28  ;;  %v2196_v51 = vmax.f32 %v2178_v55, 0.0 }
 0xdd4   : > { %v2683_v58 = vpop.f32.mrf.mxu0  ;;  %2720 = vmatmul.mubr.f32.vlgmr.msra.gmra.mxu1 %v2194_v21 }
 0xdd5   : > { %v2195_v50 = vmax.f32 %v2173_v57, 0.0  ;;  %v2188_v38 = vadd.f32 %v2683_v58, %v2464_v1 }
 0xdd6   : > { %v2182_v60 = vpop.f32.mrf.mxu0 }
 0xdd7   : > { %v2183_v61 = vadd.f32 %v2464_v1, %v2182_v60  ;;  %2722 = vmatprep.mubr.f32.mxu1 %v2195_v50  ;;  %v2198_v63 = vmax.f32 %v2188_v38, 0.0 }
 0xdd8   : > { %2723 = vmatmul.mubr.f32.gmra.mxu1 %v2196_v51 }
 0xdd9   : > { %v2197_v62 = vmax.f32 %v2183_v61, 0.0 }
 0xddb   : > { %2725 = vmatprep.mubr.f32.mxu1 %v2197_v62 }
 0xddc   : > { %2726 = vmatmul.mubr.f32.gmra.mxu1 %v2198_v63 }
 0xe90   : > { %v2718_v6 = vpop.f32.mrf.mxu0 }
 0xe91   : > { %v2294_v7 = vadd.f32 %v2718_v6, %v2473_v39 }
 0xe92   : > { %v2288_v10 = vpop.f32.mrf.mxu0 }
 0xe93   : > { %v2328_v48 = vadd.f32 %v2294_v7, %v3246_v49  ;;  %v2289_v31 = vadd.f32 %v2473_v39, %v2288_v10 }
 0xe94   : > { %v2721_v26 = vpop.f32.mrf.mxu1 }
 0xe95   : > { %2336 = vst.msk [vmem:[%s2970_s17 + $0x8] sm:$0xff] %vm454_vm0, %v2328_v48  ;;  %v2327_v9 = vadd.f32 %v2289_v31, %v3240_v11  ;;  %v2304_v27 = vadd.f32 %v2721_v26, %v2473_v39 }
 0xe96   : > { %v2298_v30 = vpop.f32.mrf.mxu1 }
 0xe97   : > { %2335 = vst.msk [vmem:[%s2970_s17] sm:$0xff] %vm454_vm0, %v2327_v9  ;;  %v2330_v34 = vadd.f32 %v2304_v27, %v3249_v4  ;;  %v2299_v35 = vadd.f32 %v2473_v39, %v2298_v30 }
 0xe98   : > { %v2724_v37 = vpop.f32.mrf.mxu1 }
 0xe99   : > { %2338 = vst.msk [vmem:[%s2970_s17 + $0x18] sm:$0xff] %vm454_vm0, %v2330_v34  ;;  %v2329_v49 = vadd.f32 %v2299_v35, %v3243_v14  ;;  %v2314_v41 = vadd.f32 %v2724_v37, %v2473_v39 }
 0xe9a   : > { %v2308_v13 = vpop.f32.mrf.mxu1 }
 0xe9b   : > { %2337 = vst.msk [vmem:[%s2970_s17 + $0x10] sm:$0xff] %vm454_vm0, %v2329_v49  ;;  %v2332_v11 = vadd.f32 %v2314_v41, %v3263_v18  ;;  %v2309_v33 = vadd.f32 %v2473_v39, %v2308_v13 }
 0xe9c   : > { %v2727_v36 = vpop.f32.mrf.mxu1 }
 0xe9d   : > { %2340 = vst.msk [vmem:[%s2970_s17 + $0x28] sm:$0xff] %vm454_vm0, %v2332_v11  ;;  %v2331_v4 = vadd.f32 %v2309_v33, %v3256_v0  ;;  %v2324_v40 = vadd.f32 %v2727_v36, %v2473_v39 }
 0xe9e   : > { %v2318_v42 = vpop.f32.mrf.mxu1 }
 0xe9f   : > { %2339 = vst.msk [vmem:[%s2970_s17 + $0x20] sm:$0xff] %vm454_vm0, %v2331_v4  ;;  %v2334_v53 = vadd.f32 %v2324_v40, %v3273_v24  ;;  %v2319_v14 = vadd.f32 %v2473_v39, %v2318_v42 }
 0xea1   : > { %2342 = vst.msk [vmem:[%s2970_s17 + $0x38] sm:$0xff] %vm454_vm0, %v2334_v53  ;;  %v2333_v43 = vadd.f32 %v2319_v14, %v3270_v23 }
 0xea3   : > { %2341 = vst.msk [vmem:[%s2970_s17 + $0x30] sm:$0xff] %vm454_vm0, %v2333_v43 }
 0xea4 PF: > { %s23_s25 = sadd.s32 1, %s2869_s25  }
 0xea5   : > { %p20_p5 = scmp.ge.s32.totalorder %s23_s25, 4  }
 0xea7   :  { %22 = sbr.rel (!%p20_p5) target bundleno = 1 (0x1), region = 122 }

</bundles_post_ra>
